<compile_context>
chip_gen: v7x
topology: tpu7x:2x2x1
jax: 0.10.0
libtpu: 0.0.40
codegen_flags: <defaults>
</compile_context>

<pallas_src>
import functools

import jax
import jax.numpy as jnp
from jax.experimental import pallas as pl
from jax.experimental.pallas import tpu as pltpu

_LANES = 128
_VMEM = pl.BlockSpec(memory_space=pltpu.MemorySpace.VMEM)


# -----------------------------------------------------------------------------
# exact-erf GELU.
# TODO(synk): lax.erf lowering support in Mosaic is uncertain, so erf is
# evaluated with the Abramowitz-Stegun 7.1.26 polynomial (|err| <= 1.5e-7,
# i.e. f32-level agreement with torch.nn.functional.gelu's exact form).
# -----------------------------------------------------------------------------
def _gelu_erf(x):
    z = x * 0.7071067811865476
    az = jnp.abs(z)
    t = 1.0 / (1.0 + 0.3275911 * az)
    poly = t * (0.254829592 + t * (-0.284496736 + t * (1.421413741
             + t * (-1.453152027 + t * 1.061405429))))
    erf_abs = 1.0 - poly * jnp.exp(-az * az)
    erf = jnp.where(z >= 0.0, erf_abs, -erf_abs)
    return 0.5 * x * (1.0 + erf)


# -----------------------------------------------------------------------------
# Single fused kernel: both GAT layers + gelu + edge MLP + sigmoid.
# -----------------------------------------------------------------------------
def _fused_forward_kernel(num_layers, *refs):
    (x0_ref, eemb_ref, eattr_ref, src_col_ref, dst_col_ref, dst_row_ref) = refs[:6]
    layer_refs = refs[6:6 + 3 * num_layers]
    (w1s_ref, w1d_ref, w1e_ref, b1_ref, w2_ref, b2_ref, out_ref) = \
        refs[6 + 3 * num_layers:]

    n = x0_ref.shape[0]          # num nodes
    e = eemb_ref.shape[0]        # num original edges
    e_sl = src_col_ref.shape[0]  # edges incl. self loops (= e + n)

    # --- 0/1 incidence built in-kernel from int32 indices (no HBM one-hot) ---
    lane_n = jax.lax.broadcasted_iota(jnp.int32, (e_sl, n), 1)   # [E_sl, N]
    sub_n = jax.lax.broadcasted_iota(jnp.int32, (n, e_sl), 0)    # [N, E_sl]
    s_m = src_col_ref[...] == lane_n                              # bool [E_sl, N]
    d_m = dst_col_ref[...] == lane_n                              # bool [E_sl, N]
    S = s_m.astype(jnp.float32)                                   # src one-hot
    D = d_m.astype(jnp.float32)                                   # dst one-hot
    Dt = (dst_row_ref[...] == sub_n).astype(jnp.float32)          # [N, E_sl]

    eattr = eattr_ref[...]                                        # [E_sl, h]

    def gat_layer(x, wext_ref, weatt_ref, bias_ref):
        h = bias_ref.shape[1]
        # W_ext = [W | W@att_src^T | W@att_dst^T]  -> a_src/a_dst ride in the
        # lane padding of the projection matmul.
        xw_ext = jnp.dot(x, wext_ref[...], preferred_element_type=jnp.float32)  # [N, h+2]
        a_dst_n = xw_ext[:, h + 1:h + 2]                                         # [N, 1]

        ge = jnp.dot(S, xw_ext, preferred_element_type=jnp.float32)              # [E_sl, h+2]
        src_feat = ge[:, :h]                                                     # gathered src feats
        a_src_e = ge[:, h:h + 1]                                                 # gathered a_src
        a_dst_e = jnp.dot(D, a_dst_n, preferred_element_type=jnp.float32)        # [E_sl, 1]
        a_edge_e = jnp.dot(eattr, weatt_ref[...],
                           preferred_element_type=jnp.float32)                   # [E_sl, 1]

        logit = a_src_e + a_dst_e + a_edge_e
        logit = jnp.where(logit >= 0.0, logit, 0.2 * logit)       # leaky_relu(0.2)

        # segment softmax over target node; every node has a self loop so
        # every column of D is non-empty.
        masked = jnp.where(d_m, logit, -1e30)                     # [E_sl, N]
        seg_max = jnp.max(masked, axis=0, keepdims=True)          # [1, N]
        per_edge_max = jnp.sum(D * seg_max, axis=-1, keepdims=True)   # [E_sl, 1]
        p = jnp.exp(logit - per_edge_max)
        seg_sum = jnp.sum(D * p, axis=0, keepdims=True)           # [1, N]
        per_edge_den = jnp.sum(D * seg_sum, axis=-1, keepdims=True)
        alpha = p / per_edge_den

        msg = alpha * src_feat                                    # [E_sl, h]
        return jnp.dot(Dt, msg, preferred_element_type=jnp.float32) + bias_ref[...]

    x = x0_ref[...]
    for l in range(num_layers):
        wext_ref, weatt_ref, bias_ref = layer_refs[3 * l:3 * l + 3]
        x = _gelu_erf(gat_layer(x, wext_ref, weatt_ref, bias_ref))
        # TODO(synk): F.dropout(p=0.1) implemented as eval-mode identity.

    # ---------------- edge MLP (original E edges only) ----------------------
    S0 = S[:e, :]                                                 # [E, N]
    D0 = D[:e, :]                                                 # [E, N]
    # project before gathering (N-granularity matmuls, E-granularity gathers)
    ps = jnp.dot(x, w1s_ref[...], preferred_element_type=jnp.float32)   # [N, h]
    pd = jnp.dot(x, w1d_ref[...], preferred_element_type=jnp.float32)   # [N, h]
    h1 = (jnp.dot(S0, ps, preferred_element_type=jnp.float32)
          + jnp.dot(D0, pd, preferred_element_type=jnp.float32)
          + jnp.dot(eemb_ref[...], w1e_ref[...],
                    preferred_element_type=jnp.float32)
          + b1_ref[...])
    h1 = jnp.maximum(h1, 0.0)                                     # ReLU
    # lane-dense output: W2/b2 are zero-padded to 128 lanes in the wrapper.
    logits = jnp.dot(h1, w2_ref[...],
                     preferred_element_type=jnp.float32) + b2_ref[...]   # [E, 128]
    out_ref[...] = jax.nn.sigmoid(logits).astype(out_ref.dtype)


# -----------------------------------------------------------------------------
# JAX wrapper: index/self-loop/weight-folding prep + single pallas_call.
# -----------------------------------------------------------------------------
@functools.partial(jax.jit, static_argnames=("num_nodes",))
def cascade_gnn_forward(edge_index, params, num_nodes):
    src = edge_index[0].astype(jnp.int32)
    dst = edge_index[1].astype(jnp.int32)
    x0 = params["node_emb"]                       # [N, node_dim]
    eemb = params["edge_emb"]                     # [E, h]
    num_edges = eemb.shape[0]
    num_layers = len(params["convs"])

    # self loops (PyG add_self_loops, fill_value='mean'; 0 for no in-edges)
    rng = jnp.arange(num_nodes, dtype=jnp.int32)
    src_sl = jnp.concatenate([src, rng])
    dst_sl = jnp.concatenate([dst, rng])
    sums = jax.ops.segment_sum(eemb, dst, num_segments=num_nodes)
    cnt = jax.ops.segment_sum(jnp.ones((num_edges,), jnp.float32), dst,
                              num_segments=num_nodes)
    loop_attr = sums / jnp.maximum(cnt, 1.0)[:, None]
    eattr_sl = jnp.concatenate([eemb, loop_attr], axis=0)          # [E+N, h]

    src_col = src_sl[:, None]                                      # [E+N, 1]
    dst_col = dst_sl[:, None]                                      # [E+N, 1]
    dst_row = dst_sl[None, :]                                      # [1, E+N]

    # fold attention vectors into the projection weights
    layer_args = []
    for layer in params["convs"]:
        w_ext = jnp.concatenate(
            [layer["W"],
             layer["W"] @ layer["att_src"].T,
             layer["W"] @ layer["att_dst"].T], axis=1)             # [in, h+2]
        we_att = layer["We"] @ layer["att_edge"].T                 # [h, 1]
        layer_args += [w_ext, we_att, layer["bias"]]

    mlp = params["mlp"]
    w2_pad = jnp.pad(mlp["W2"], ((0, 0), (0, _LANES - 1)))         # [h, 128]
    b2_pad = jnp.pad(mlp["b2"], ((0, 0), (0, _LANES - 1)))         # [1, 128]

    inputs = (x0, eemb, eattr_sl, src_col, dst_col, dst_row,
              *layer_args,
              mlp["W1s"], mlp["W1d"], mlp["W1e"], mlp["b1"], w2_pad, b2_pad)

    probs_full = pl.pallas_call(
        functools.partial(_fused_forward_kernel, num_layers),
        out_shape=jax.ShapeDtypeStruct((num_edges, _LANES), jnp.float32),
        in_specs=[_VMEM] * len(inputs),
        out_specs=_VMEM,
        compiler_params=pltpu.CompilerParams(vmem_limit_bytes=16 * 1024 * 1024),
    )(*inputs)
    return probs_full[:, :1]                                       # [E, 1]


# -----------------------------------------------------------------------------
# Deterministic parameter construction (shapes from CascadeGNN.__init__).
# -----------------------------------------------------------------------------
def make_params(key, num_nodes, num_edges, node_dim, hidden_dim, num_layers):
    keys = iter(jax.random.split(key, 64))
    nrm = lambda k, s, sc: (sc * jax.random.normal(k, s)).astype(jnp.float32)

    params = {
        "node_emb": nrm(next(keys), (num_nodes, node_dim), 1.0),
        "edge_emb": nrm(next(keys), (num_edges, hidden_dim), 1.0),
        "convs": [],
    }
    in_dim = node_dim
    for _ in range(num_layers):
        params["convs"].append(dict(
            W=nrm(next(keys), (in_dim, hidden_dim), 1.0 / (in_dim ** 0.5)),
            We=nrm(next(keys), (hidden_dim, hidden_dim), 1.0 / (hidden_dim ** 0.5)),
            att_src=nrm(next(keys), (1, hidden_dim), 1.0 / (hidden_dim ** 0.5)),
            att_dst=nrm(next(keys), (1, hidden_dim), 1.0 / (hidden_dim ** 0.5)),
            att_edge=nrm(next(keys), (1, hidden_dim), 1.0 / (hidden_dim ** 0.5)),
            bias=jnp.zeros((1, hidden_dim), jnp.float32),
        ))
        in_dim = hidden_dim
    sc1 = 1.0 / ((3 * hidden_dim) ** 0.5)
    params["mlp"] = dict(
        W1s=nrm(next(keys), (hidden_dim, hidden_dim), sc1),
        W1d=nrm(next(keys), (hidden_dim, hidden_dim), sc1),
        W1e=nrm(next(keys), (hidden_dim, hidden_dim), sc1),
        b1=jnp.zeros((1, hidden_dim), jnp.float32),
        W2=nrm(next(keys), (hidden_dim, 1), 1.0 / (hidden_dim ** 0.5)),
        b2=jnp.zeros((1, 1), jnp.float32),
    )
    return params


if __name__ == "__main__":
    num_nodes, num_edges = 16, 32
    node_dim, hidden_dim, num_layers = 64, 16, 2

    key = jax.random.PRNGKey(0)
    k_idx, k_src, k_dst = jax.random.split(key, 3)

    # deterministic edge_index (no self-loops, matching PyG preconditions)
    src = jax.random.randint(k_src, (num_edges,), 0, num_nodes, dtype=jnp.int32)
    dst = jax.random.randint(k_dst, (num_edges,), 0, num_nodes, dtype=jnp.int32)
    dst = jnp.where(dst == src, (dst + 1) % num_nodes, dst)
    edge_index = jnp.stack([src, dst])                     # [2, E]

    params = make_params(k_idx, num_nodes, num_edges, node_dim, hidden_dim,
                         num_layers)

    probs = cascade_gnn_forward(edge_index, params, num_nodes=num_nodes)  # [E, 1]
    probs = jax.block_until_ready(probs)

    # Build the dict-of-edge-probabilities output like the torch module.
    edge_probabilities = {
        (int(s), int(t)): float(probs[i, 0])
        for i, (s, t) in enumerate(zip(src.tolist(), dst.tolist()))
    }
    assert probs.shape == (num_edges, 1)
    assert bool(jnp.all((probs >= 0.0) & (probs <= 1.0)))
    print("KERNEL_OK")
</pallas_src>

<mosaic_0001>
module attributes {stable_mosaic.version = 11 : i64} {
  func.func private @main(%arg0: i32) attributes {dimension_semantics = [#tpu.dimension_semantics<core_parallel>], iteration_bounds = array<i64: 2>, tpu.core_type = #tpu.core_type<sc_scalar_subcore>, window_params = []} {
    return
  }
}

module attributes {stable_mosaic.version = 11 : i64} {
  func.func private @main(%arg0: i32) attributes {dimension_semantics = [#tpu.dimension_semantics<core_parallel>], iteration_bounds = array<i64: 2>, tpu.core_type = #tpu.core_type<sc_scalar_subcore>, window_params = []} {
    return
  }
}

module attributes {stable_mosaic.version = 11 : i64} {
  func.func @_fused_forward_kernel(%arg0: memref<16x64xf32, #tpu.memory_space<vmem>>, %arg1: memref<32x16xf32, #tpu.memory_space<vmem>>, %arg2: memref<48x16xf32, #tpu.memory_space<vmem>>, %arg3: memref<48x1xi32, #tpu.memory_space<vmem>>, %arg4: memref<48x1xi32, #tpu.memory_space<vmem>>, %arg5: memref<1x48xi32, #tpu.memory_space<vmem>>, %arg6: memref<64x18xf32, #tpu.memory_space<vmem>>, %arg7: memref<16x1xf32, #tpu.memory_space<vmem>>, %arg8: memref<1x16xf32, #tpu.memory_space<vmem>>, %arg9: memref<16x18xf32, #tpu.memory_space<vmem>>, %arg10: memref<16x1xf32, #tpu.memory_space<vmem>>, %arg11: memref<1x16xf32, #tpu.memory_space<vmem>>, %arg12: memref<16x16xf32, #tpu.memory_space<vmem>>, %arg13: memref<16x16xf32, #tpu.memory_space<vmem>>, %arg14: memref<16x16xf32, #tpu.memory_space<vmem>>, %arg15: memref<1x16xf32, #tpu.memory_space<vmem>>, %arg16: memref<16x128xf32, #tpu.memory_space<vmem>>, %arg17: memref<1x128xf32, #tpu.memory_space<vmem>>, %arg18: memref<32x128xf32, #tpu.memory_space<vmem>>) attributes {dimension_semantics = [], scalar_prefetch = 0 : i64, scratch_operands = 0 : i64, tpu.core_type = #tpu.core_type<tc>} {
    %0 = tpu.iota {dimensions = array<i32: 1>} : vector<48x16xi32>
    %1 = tpu.iota {dimensions = array<i32: 0>} : vector<16x48xi32>
    %c0 = arith.constant 0 : index
    %c0_0 = arith.constant 0 : index
    %2 = vector.load %arg3[%c0, %c0_0] : memref<48x1xi32, #tpu.memory_space<vmem>>, vector<48x1xi32>
    %3 = vector.broadcast %2 : vector<48x1xi32> to vector<48x16xi32>
    %4 = arith.cmpi eq, %3, %0 : vector<48x16xi32>
    %c0_1 = arith.constant 0 : index
    %c0_2 = arith.constant 0 : index
    %5 = vector.load %arg4[%c0_1, %c0_2] : memref<48x1xi32, #tpu.memory_space<vmem>>, vector<48x1xi32>
    %6 = vector.broadcast %5 : vector<48x1xi32> to vector<48x16xi32>
    %7 = arith.cmpi eq, %6, %0 : vector<48x16xi32>
    %8 = arith.extui %4 : vector<48x16xi1> to vector<48x16xi32>
    %9 = arith.sitofp %8 : vector<48x16xi32> to vector<48x16xf32>
    %10 = arith.extui %7 : vector<48x16xi1> to vector<48x16xi32>
    %11 = arith.sitofp %10 : vector<48x16xi32> to vector<48x16xf32>
    %c0_3 = arith.constant 0 : index
    %c0_4 = arith.constant 0 : index
    %12 = vector.load %arg5[%c0_3, %c0_4] : memref<1x48xi32, #tpu.memory_space<vmem>>, vector<1x48xi32>
    %13 = vector.broadcast %12 : vector<1x48xi32> to vector<16x48xi32>
    %14 = arith.cmpi eq, %13, %1 : vector<16x48xi32>
    %15 = arith.extui %14 : vector<16x48xi1> to vector<16x48xi32>
    %16 = arith.sitofp %15 : vector<16x48xi32> to vector<16x48xf32>
    %c0_5 = arith.constant 0 : index
    %c0_6 = arith.constant 0 : index
    %17 = vector.load %arg2[%c0_5, %c0_6] : memref<48x16xf32, #tpu.memory_space<vmem>>, vector<48x16xf32>
    %c0_7 = arith.constant 0 : index
    %c0_8 = arith.constant 0 : index
    %18 = vector.load %arg0[%c0_7, %c0_8] : memref<16x64xf32, #tpu.memory_space<vmem>>, vector<16x64xf32>
    %c0_9 = arith.constant 0 : index
    %c0_10 = arith.constant 0 : index
    %19 = vector.load %arg6[%c0_9, %c0_10] : memref<64x18xf32, #tpu.memory_space<vmem>>, vector<64x18xf32>
    %cst = arith.constant dense<0.000000e+00> : vector<16x18xf32>
    %20 = tpu.matmul %18, %19, %cst {dimension_numbers = #tpu.dot_dimension_numbers<[1], [0], [0], [1], [0, 0, 1, 1], [], []>} : vector<16x64xf32>, vector<64x18xf32>, vector<16x18xf32> -> vector<16x18xf32>
    %21 = vector.extract_strided_slice %20 {offsets = [0, 17], sizes = [16, 1], strides = [1, 1]} : vector<16x18xf32> to vector<16x1xf32>
    %cst_11 = arith.constant dense<0.000000e+00> : vector<48x18xf32>
    %22 = tpu.matmul %9, %20, %cst_11 {dimension_numbers = #tpu.dot_dimension_numbers<[1], [0], [0], [1], [0, 0, 1, 1], [], []>} : vector<48x16xf32>, vector<16x18xf32>, vector<48x18xf32> -> vector<48x18xf32>
    %23 = vector.extract_strided_slice %22 {offsets = [0, 0], sizes = [48, 16], strides = [1, 1]} : vector<48x18xf32> to vector<48x16xf32>
    %24 = vector.extract_strided_slice %22 {offsets = [0, 16], sizes = [48, 1], strides = [1, 1]} : vector<48x18xf32> to vector<48x1xf32>
    %cst_12 = arith.constant dense<0.000000e+00> : vector<48x1xf32>
    %25 = tpu.matmul %11, %21, %cst_12 {dimension_numbers = #tpu.dot_dimension_numbers<[1], [0], [0], [1], [0, 0, 1, 1], [], []>} : vector<48x16xf32>, vector<16x1xf32>, vector<48x1xf32> -> vector<48x1xf32>
    %c0_13 = arith.constant 0 : index
    %c0_14 = arith.constant 0 : index
    %26 = vector.load %arg7[%c0_13, %c0_14] : memref<16x1xf32, #tpu.memory_space<vmem>>, vector<16x1xf32>
    %cst_15 = arith.constant dense<0.000000e+00> : vector<48x1xf32>
    %27 = tpu.matmul %17, %26, %cst_15 {dimension_numbers = #tpu.dot_dimension_numbers<[1], [0], [0], [1], [0, 0, 1, 1], [], []>} : vector<48x16xf32>, vector<16x1xf32>, vector<48x1xf32> -> vector<48x1xf32>
    %28 = arith.addf %24, %25 : vector<48x1xf32>
    %29 = arith.addf %28, %27 : vector<48x1xf32>
    %cst_16 = arith.constant 0.000000e+00 : f32
    %30 = vector.broadcast %cst_16 : f32 to vector<48x1xf32>
    %31 = arith.cmpf oge, %29, %30 : vector<48x1xf32>
    %cst_17 = arith.constant 2.000000e-01 : f32
    %32 = vector.broadcast %cst_17 : f32 to vector<48x1xf32>
    %33 = arith.mulf %32, %29 : vector<48x1xf32>
    %34 = arith.select %31, %29, %33 : vector<48x1xi1>, vector<48x1xf32>
    %cst_18 = arith.constant -1.000000e+30 : f32
    %35 = vector.shape_cast %34 : vector<48x1xf32> to vector<48x1xf32>
    %36 = vector.broadcast %35 : vector<48x1xf32> to vector<48x16xf32>
    %37 = vector.broadcast %cst_18 : f32 to vector<48x16xf32>
    %38 = arith.select %7, %36, %37 : vector<48x16xi1>, vector<48x16xf32>
    %cst_19 = arith.constant dense<0xFF800000> : vector<16xf32>
    %39 = vector.multi_reduction <maximumf>, %38, %cst_19 [0] : vector<48x16xf32> to vector<16xf32>
    %40 = vector.shape_cast %39 : vector<16xf32> to vector<1x16xf32>
    %41 = vector.broadcast %40 : vector<1x16xf32> to vector<48x16xf32>
    %42 = arith.mulf %11, %41 : vector<48x16xf32>
    %cst_20 = arith.constant dense<0.000000e+00> : vector<48xf32>
    %43 = vector.multi_reduction <add>, %42, %cst_20 [1] : vector<48x16xf32> to vector<48xf32>
    %44 = vector.shape_cast %43 : vector<48xf32> to vector<48x1xf32>
    %45 = arith.subf %34, %44 : vector<48x1xf32>
    %46 = math.exp %45 : vector<48x1xf32>
    %47 = vector.broadcast %46 : vector<48x1xf32> to vector<48x16xf32>
    %48 = arith.mulf %11, %47 : vector<48x16xf32>
    %cst_21 = arith.constant dense<0.000000e+00> : vector<16xf32>
    %49 = vector.multi_reduction <add>, %48, %cst_21 [0] : vector<48x16xf32> to vector<16xf32>
    %50 = vector.shape_cast %49 : vector<16xf32> to vector<1x16xf32>
    %51 = vector.broadcast %50 : vector<1x16xf32> to vector<48x16xf32>
    %52 = arith.mulf %11, %51 : vector<48x16xf32>
    %cst_22 = arith.constant dense<0.000000e+00> : vector<48xf32>
    %53 = vector.multi_reduction <add>, %52, %cst_22 [1] : vector<48x16xf32> to vector<48xf32>
    %54 = vector.shape_cast %53 : vector<48xf32> to vector<48x1xf32>
    %55 = arith.divf %46, %54 : vector<48x1xf32>
    %56 = vector.broadcast %55 : vector<48x1xf32> to vector<48x16xf32>
    %57 = arith.mulf %56, %23 : vector<48x16xf32>
    %cst_23 = arith.constant dense<0.000000e+00> : vector<16x16xf32>
    %58 = tpu.matmul %16, %57, %cst_23 {dimension_numbers = #tpu.dot_dimension_numbers<[1], [0], [0], [1], [0, 0, 1, 1], [], []>} : vector<16x48xf32>, vector<48x16xf32>, vector<16x16xf32> -> vector<16x16xf32>
    %c0_24 = arith.constant 0 : index
    %c0_25 = arith.constant 0 : index
    %59 = vector.load %arg8[%c0_24, %c0_25] : memref<1x16xf32, #tpu.memory_space<vmem>>, vector<1x16xf32>
    %60 = vector.broadcast %59 : vector<1x16xf32> to vector<16x16xf32>
    %61 = arith.addf %58, %60 : vector<16x16xf32>
    %cst_26 = arith.constant 0.707106769 : f32
    %62 = vector.broadcast %cst_26 : f32 to vector<16x16xf32>
    %63 = arith.mulf %61, %62 : vector<16x16xf32>
    %64 = math.absf %63 : vector<16x16xf32>
    %cst_27 = arith.constant 0.327591091 : f32
    %65 = vector.broadcast %cst_27 : f32 to vector<16x16xf32>
    %66 = arith.mulf %65, %64 : vector<16x16xf32>
    %cst_28 = arith.constant 1.000000e+00 : f32
    %67 = vector.broadcast %cst_28 : f32 to vector<16x16xf32>
    %68 = arith.addf %67, %66 : vector<16x16xf32>
    %cst_29 = arith.constant 1.000000e+00 : f32
    %69 = vector.broadcast %cst_29 : f32 to vector<16x16xf32>
    %70 = arith.divf %69, %68 : vector<16x16xf32>
    %cst_30 = arith.constant 1.06140542 : f32
    %71 = vector.broadcast %cst_30 : f32 to vector<16x16xf32>
    %72 = arith.mulf %70, %71 : vector<16x16xf32>
    %cst_31 = arith.constant -1.45315206 : f32
    %73 = vector.broadcast %cst_31 : f32 to vector<16x16xf32>
    %74 = arith.addf %73, %72 : vector<16x16xf32>
    %75 = arith.mulf %70, %74 : vector<16x16xf32>
    %cst_32 = arith.constant 1.42141378 : f32
    %76 = vector.broadcast %cst_32 : f32 to vector<16x16xf32>
    %77 = arith.addf %76, %75 : vector<16x16xf32>
    %78 = arith.mulf %70, %77 : vector<16x16xf32>
    %cst_33 = arith.constant -0.284496725 : f32
    %79 = vector.broadcast %cst_33 : f32 to vector<16x16xf32>
    %80 = arith.addf %79, %78 : vector<16x16xf32>
    %81 = arith.mulf %70, %80 : vector<16x16xf32>
    %cst_34 = arith.constant 0.254829586 : f32
    %82 = vector.broadcast %cst_34 : f32 to vector<16x16xf32>
    %83 = arith.addf %82, %81 : vector<16x16xf32>
    %84 = arith.mulf %70, %83 : vector<16x16xf32>
    %cst_35 = arith.constant 0.000000e+00 : f32
    %85 = vector.broadcast %cst_35 : f32 to vector<16x16xf32>
    %86 = arith.subf %85, %64 : vector<16x16xf32>
    %87 = arith.mulf %86, %64 : vector<16x16xf32>
    %88 = math.exp %87 : vector<16x16xf32>
    %89 = arith.mulf %84, %88 : vector<16x16xf32>
    %cst_36 = arith.constant 1.000000e+00 : f32
    %90 = vector.broadcast %cst_36 : f32 to vector<16x16xf32>
    %91 = arith.subf %90, %89 : vector<16x16xf32>
    %cst_37 = arith.constant 0.000000e+00 : f32
    %92 = vector.broadcast %cst_37 : f32 to vector<16x16xf32>
    %93 = arith.cmpf oge, %63, %92 : vector<16x16xf32>
    %cst_38 = arith.constant 0.000000e+00 : f32
    %94 = vector.broadcast %cst_38 : f32 to vector<16x16xf32>
    %95 = arith.subf %94, %91 : vector<16x16xf32>
    %96 = arith.select %93, %91, %95 : vector<16x16xi1>, vector<16x16xf32>
    %cst_39 = arith.constant 5.000000e-01 : f32
    %97 = vector.broadcast %cst_39 : f32 to vector<16x16xf32>
    %98 = arith.mulf %97, %61 : vector<16x16xf32>
    %cst_40 = arith.constant 1.000000e+00 : f32
    %99 = vector.broadcast %cst_40 : f32 to vector<16x16xf32>
    %100 = arith.addf %99, %96 : vector<16x16xf32>
    %101 = arith.mulf %98, %100 : vector<16x16xf32>
    %c0_41 = arith.constant 0 : index
    %c0_42 = arith.constant 0 : index
    %102 = vector.load %arg9[%c0_41, %c0_42] : memref<16x18xf32, #tpu.memory_space<vmem>>, vector<16x18xf32>
    %cst_43 = arith.constant dense<0.000000e+00> : vector<16x18xf32>
    %103 = tpu.matmul %101, %102, %cst_43 {dimension_numbers = #tpu.dot_dimension_numbers<[1], [0], [0], [1], [0, 0, 1, 1], [], []>} : vector<16x16xf32>, vector<16x18xf32>, vector<16x18xf32> -> vector<16x18xf32>
    %104 = vector.extract_strided_slice %103 {offsets = [0, 17], sizes = [16, 1], strides = [1, 1]} : vector<16x18xf32> to vector<16x1xf32>
    %cst_44 = arith.constant dense<0.000000e+00> : vector<48x18xf32>
    %105 = tpu.matmul %9, %103, %cst_44 {dimension_numbers = #tpu.dot_dimension_numbers<[1], [0], [0], [1], [0, 0, 1, 1], [], []>} : vector<48x16xf32>, vector<16x18xf32>, vector<48x18xf32> -> vector<48x18xf32>
    %106 = vector.extract_strided_slice %105 {offsets = [0, 0], sizes = [48, 16], strides = [1, 1]} : vector<48x18xf32> to vector<48x16xf32>
    %107 = vector.extract_strided_slice %105 {offsets = [0, 16], sizes = [48, 1], strides = [1, 1]} : vector<48x18xf32> to vector<48x1xf32>
    %cst_45 = arith.constant dense<0.000000e+00> : vector<48x1xf32>
    %108 = tpu.matmul %11, %104, %cst_45 {dimension_numbers = #tpu.dot_dimension_numbers<[1], [0], [0], [1], [0, 0, 1, 1], [], []>} : vector<48x16xf32>, vector<16x1xf32>, vector<48x1xf32> -> vector<48x1xf32>
    %c0_46 = arith.constant 0 : index
    %c0_47 = arith.constant 0 : index
    %109 = vector.load %arg10[%c0_46, %c0_47] : memref<16x1xf32, #tpu.memory_space<vmem>>, vector<16x1xf32>
    %cst_48 = arith.constant dense<0.000000e+00> : vector<48x1xf32>
    %110 = tpu.matmul %17, %109, %cst_48 {dimension_numbers = #tpu.dot_dimension_numbers<[1], [0], [0], [1], [0, 0, 1, 1], [], []>} : vector<48x16xf32>, vector<16x1xf32>, vector<48x1xf32> -> vector<48x1xf32>
    %111 = arith.addf %107, %108 : vector<48x1xf32>
    %112 = arith.addf %111, %110 : vector<48x1xf32>
    %cst_49 = arith.constant 0.000000e+00 : f32
    %113 = vector.broadcast %cst_49 : f32 to vector<48x1xf32>
    %114 = arith.cmpf oge, %112, %113 : vector<48x1xf32>
    %cst_50 = arith.constant 2.000000e-01 : f32
    %115 = vector.broadcast %cst_50 : f32 to vector<48x1xf32>
    %116 = arith.mulf %115, %112 : vector<48x1xf32>
    %117 = arith.select %114, %112, %116 : vector<48x1xi1>, vector<48x1xf32>
    %cst_51 = arith.constant -1.000000e+30 : f32
    %118 = vector.shape_cast %117 : vector<48x1xf32> to vector<48x1xf32>
    %119 = vector.broadcast %118 : vector<48x1xf32> to vector<48x16xf32>
    %120 = vector.broadcast %cst_51 : f32 to vector<48x16xf32>
    %121 = arith.select %7, %119, %120 : vector<48x16xi1>, vector<48x16xf32>
    %cst_52 = arith.constant dense<0xFF800000> : vector<16xf32>
    %122 = vector.multi_reduction <maximumf>, %121, %cst_52 [0] : vector<48x16xf32> to vector<16xf32>
    %123 = vector.shape_cast %122 : vector<16xf32> to vector<1x16xf32>
    %124 = vector.broadcast %123 : vector<1x16xf32> to vector<48x16xf32>
    %125 = arith.mulf %11, %124 : vector<48x16xf32>
    %cst_53 = arith.constant dense<0.000000e+00> : vector<48xf32>
    %126 = vector.multi_reduction <add>, %125, %cst_53 [1] : vector<48x16xf32> to vector<48xf32>
    %127 = vector.shape_cast %126 : vector<48xf32> to vector<48x1xf32>
    %128 = arith.subf %117, %127 : vector<48x1xf32>
    %129 = math.exp %128 : vector<48x1xf32>
    %130 = vector.broadcast %129 : vector<48x1xf32> to vector<48x16xf32>
    %131 = arith.mulf %11, %130 : vector<48x16xf32>
    %cst_54 = arith.constant dense<0.000000e+00> : vector<16xf32>
    %132 = vector.multi_reduction <add>, %131, %cst_54 [0] : vector<48x16xf32> to vector<16xf32>
    %133 = vector.shape_cast %132 : vector<16xf32> to vector<1x16xf32>
    %134 = vector.broadcast %133 : vector<1x16xf32> to vector<48x16xf32>
    %135 = arith.mulf %11, %134 : vector<48x16xf32>
    %cst_55 = arith.constant dense<0.000000e+00> : vector<48xf32>
    %136 = vector.multi_reduction <add>, %135, %cst_55 [1] : vector<48x16xf32> to vector<48xf32>
    %137 = vector.shape_cast %136 : vector<48xf32> to vector<48x1xf32>
    %138 = arith.divf %129, %137 : vector<48x1xf32>
    %139 = vector.broadcast %138 : vector<48x1xf32> to vector<48x16xf32>
    %140 = arith.mulf %139, %106 : vector<48x16xf32>
    %cst_56 = arith.constant dense<0.000000e+00> : vector<16x16xf32>
    %141 = tpu.matmul %16, %140, %cst_56 {dimension_numbers = #tpu.dot_dimension_numbers<[1], [0], [0], [1], [0, 0, 1, 1], [], []>} : vector<16x48xf32>, vector<48x16xf32>, vector<16x16xf32> -> vector<16x16xf32>
    %c0_57 = arith.constant 0 : index
    %c0_58 = arith.constant 0 : index
    %142 = vector.load %arg11[%c0_57, %c0_58] : memref<1x16xf32, #tpu.memory_space<vmem>>, vector<1x16xf32>
    %143 = vector.broadcast %142 : vector<1x16xf32> to vector<16x16xf32>
    %144 = arith.addf %141, %143 : vector<16x16xf32>
    %cst_59 = arith.constant 0.707106769 : f32
    %145 = vector.broadcast %cst_59 : f32 to vector<16x16xf32>
    %146 = arith.mulf %144, %145 : vector<16x16xf32>
    %147 = math.absf %146 : vector<16x16xf32>
    %cst_60 = arith.constant 0.327591091 : f32
    %148 = vector.broadcast %cst_60 : f32 to vector<16x16xf32>
    %149 = arith.mulf %148, %147 : vector<16x16xf32>
    %cst_61 = arith.constant 1.000000e+00 : f32
    %150 = vector.broadcast %cst_61 : f32 to vector<16x16xf32>
    %151 = arith.addf %150, %149 : vector<16x16xf32>
    %cst_62 = arith.constant 1.000000e+00 : f32
    %152 = vector.broadcast %cst_62 : f32 to vector<16x16xf32>
    %153 = arith.divf %152, %151 : vector<16x16xf32>
    %cst_63 = arith.constant 1.06140542 : f32
    %154 = vector.broadcast %cst_63 : f32 to vector<16x16xf32>
    %155 = arith.mulf %153, %154 : vector<16x16xf32>
    %cst_64 = arith.constant -1.45315206 : f32
    %156 = vector.broadcast %cst_64 : f32 to vector<16x16xf32>
    %157 = arith.addf %156, %155 : vector<16x16xf32>
    %158 = arith.mulf %153, %157 : vector<16x16xf32>
    %cst_65 = arith.constant 1.42141378 : f32
    %159 = vector.broadcast %cst_65 : f32 to vector<16x16xf32>
    %160 = arith.addf %159, %158 : vector<16x16xf32>
    %161 = arith.mulf %153, %160 : vector<16x16xf32>
    %cst_66 = arith.constant -0.284496725 : f32
    %162 = vector.broadcast %cst_66 : f32 to vector<16x16xf32>
    %163 = arith.addf %162, %161 : vector<16x16xf32>
    %164 = arith.mulf %153, %163 : vector<16x16xf32>
    %cst_67 = arith.constant 0.254829586 : f32
    %165 = vector.broadcast %cst_67 : f32 to vector<16x16xf32>
    %166 = arith.addf %165, %164 : vector<16x16xf32>
    %167 = arith.mulf %153, %166 : vector<16x16xf32>
    %cst_68 = arith.constant 0.000000e+00 : f32
    %168 = vector.broadcast %cst_68 : f32 to vector<16x16xf32>
    %169 = arith.subf %168, %147 : vector<16x16xf32>
    %170 = arith.mulf %169, %147 : vector<16x16xf32>
    %171 = math.exp %170 : vector<16x16xf32>
    %172 = arith.mulf %167, %171 : vector<16x16xf32>
    %cst_69 = arith.constant 1.000000e+00 : f32
    %173 = vector.broadcast %cst_69 : f32 to vector<16x16xf32>
    %174 = arith.subf %173, %172 : vector<16x16xf32>
    %cst_70 = arith.constant 0.000000e+00 : f32
    %175 = vector.broadcast %cst_70 : f32 to vector<16x16xf32>
    %176 = arith.cmpf oge, %146, %175 : vector<16x16xf32>
    %cst_71 = arith.constant 0.000000e+00 : f32
    %177 = vector.broadcast %cst_71 : f32 to vector<16x16xf32>
    %178 = arith.subf %177, %174 : vector<16x16xf32>
    %179 = arith.select %176, %174, %178 : vector<16x16xi1>, vector<16x16xf32>
    %cst_72 = arith.constant 5.000000e-01 : f32
    %180 = vector.broadcast %cst_72 : f32 to vector<16x16xf32>
    %181 = arith.mulf %180, %144 : vector<16x16xf32>
    %cst_73 = arith.constant 1.000000e+00 : f32
    %182 = vector.broadcast %cst_73 : f32 to vector<16x16xf32>
    %183 = arith.addf %182, %179 : vector<16x16xf32>
    %184 = arith.mulf %181, %183 : vector<16x16xf32>
    %185 = vector.extract_strided_slice %9 {offsets = [0, 0], sizes = [32, 16], strides = [1, 1]} : vector<48x16xf32> to vector<32x16xf32>
    %186 = vector.extract_strided_slice %11 {offsets = [0, 0], sizes = [32, 16], strides = [1, 1]} : vector<48x16xf32> to vector<32x16xf32>
    %c0_74 = arith.constant 0 : index
    %c0_75 = arith.constant 0 : index
    %187 = vector.load %arg12[%c0_74, %c0_75] : memref<16x16xf32, #tpu.memory_space<vmem>>, vector<16x16xf32>
    %cst_76 = arith.constant dense<0.000000e+00> : vector<16x16xf32>
    %188 = tpu.matmul %184, %187, %cst_76 {dimension_numbers = #tpu.dot_dimension_numbers<[1], [0], [0], [1], [0, 0, 1, 1], [], []>} : vector<16x16xf32>, vector<16x16xf32>, vector<16x16xf32> -> vector<16x16xf32>
    %c0_77 = arith.constant 0 : index
    %c0_78 = arith.constant 0 : index
    %189 = vector.load %arg13[%c0_77, %c0_78] : memref<16x16xf32, #tpu.memory_space<vmem>>, vector<16x16xf32>
    %cst_79 = arith.constant dense<0.000000e+00> : vector<16x16xf32>
    %190 = tpu.matmul %184, %189, %cst_79 {dimension_numbers = #tpu.dot_dimension_numbers<[1], [0], [0], [1], [0, 0, 1, 1], [], []>} : vector<16x16xf32>, vector<16x16xf32>, vector<16x16xf32> -> vector<16x16xf32>
    %cst_80 = arith.constant dense<0.000000e+00> : vector<32x16xf32>
    %191 = tpu.matmul %185, %188, %cst_80 {dimension_numbers = #tpu.dot_dimension_numbers<[1], [0], [0], [1], [0, 0, 1, 1], [], []>} : vector<32x16xf32>, vector<16x16xf32>, vector<32x16xf32> -> vector<32x16xf32>
    %cst_81 = arith.constant dense<0.000000e+00> : vector<32x16xf32>
    %192 = tpu.matmul %186, %190, %cst_81 {dimension_numbers = #tpu.dot_dimension_numbers<[1], [0], [0], [1], [0, 0, 1, 1], [], []>} : vector<32x16xf32>, vector<16x16xf32>, vector<32x16xf32> -> vector<32x16xf32>
    %193 = arith.addf %191, %192 : vector<32x16xf32>
    %c0_82 = arith.constant 0 : index
    %c0_83 = arith.constant 0 : index
    %194 = vector.load %arg1[%c0_82, %c0_83] : memref<32x16xf32, #tpu.memory_space<vmem>>, vector<32x16xf32>
    %c0_84 = arith.constant 0 : index
    %c0_85 = arith.constant 0 : index
    %195 = vector.load %arg14[%c0_84, %c0_85] : memref<16x16xf32, #tpu.memory_space<vmem>>, vector<16x16xf32>
    %cst_86 = arith.constant dense<0.000000e+00> : vector<32x16xf32>
    %196 = tpu.matmul %194, %195, %cst_86 {dimension_numbers = #tpu.dot_dimension_numbers<[1], [0], [0], [1], [0, 0, 1, 1], [], []>} : vector<32x16xf32>, vector<16x16xf32>, vector<32x16xf32> -> vector<32x16xf32>
    %197 = arith.addf %193, %196 : vector<32x16xf32>
    %c0_87 = arith.constant 0 : index
    %c0_88 = arith.constant 0 : index
    %198 = vector.load %arg15[%c0_87, %c0_88] : memref<1x16xf32, #tpu.memory_space<vmem>>, vector<1x16xf32>
    %199 = vector.broadcast %198 : vector<1x16xf32> to vector<32x16xf32>
    %200 = arith.addf %197, %199 : vector<32x16xf32>
    %cst_89 = arith.constant 0.000000e+00 : f32
    %201 = vector.broadcast %cst_89 : f32 to vector<32x16xf32>
    %202 = arith.maximumf %200, %201 : vector<32x16xf32>
    %c0_90 = arith.constant 0 : index
    %c0_91 = arith.constant 0 : index
    %203 = vector.load %arg16[%c0_90, %c0_91] : memref<16x128xf32, #tpu.memory_space<vmem>>, vector<16x128xf32>
    %cst_92 = arith.constant dense<0.000000e+00> : vector<32x128xf32>
    %204 = tpu.matmul %202, %203, %cst_92 {dimension_numbers = #tpu.dot_dimension_numbers<[1], [0], [0], [1], [0, 0, 1, 1], [], []>} : vector<32x16xf32>, vector<16x128xf32>, vector<32x128xf32> -> vector<32x128xf32>
    %c0_93 = arith.constant 0 : index
    %c0_94 = arith.constant 0 : index
    %205 = vector.load %arg17[%c0_93, %c0_94] : memref<1x128xf32, #tpu.memory_space<vmem>>, vector<1x128xf32>
    %206 = vector.broadcast %205 : vector<1x128xf32> to vector<32x128xf32>
    %207 = arith.addf %204, %206 : vector<32x128xf32>
    %208 = arith.negf %207 : vector<32x128xf32>
    %209 = math.exp %208 : vector<32x128xf32>
    %cst_95 = arith.constant 1.000000e+00 : f32
    %210 = vector.broadcast %cst_95 : f32 to vector<32x128xf32>
    %211 = arith.addf %210, %209 : vector<32x128xf32>
    %212 = arith.divf %210, %211 : vector<32x128xf32>
    %c0_96 = arith.constant 0 : index
    %c0_97 = arith.constant 0 : index
    %213 = vector.load %arg18[%c0_96, %c0_97] : memref<32x128xf32, #tpu.memory_space<vmem>>, vector<32x128xf32>
    tpu.vector_store %arg18[%c0_96, %c0_97], %212 {strides = array<i32>} : memref<32x128xf32, #tpu.memory_space<vmem>>, vector<32x128xf32>,
    return
  }
}

</mosaic_0001>

<bundles_post_ra>
// kernel: cascade_gnn_forward.1
= control target key start
LH: loop header
LB: loop body
LE: loop exit
PB: predicated region body
PF: predicated region fallthrough
CT: control target
= control target key end

     0   :  { %vm175_vm0 = vcmask 523264   ;;  %v3036_v3 = vmov 0   ;;  %v59_v26 = vlaneseq  ;;  %vm257_vm1 = vcmask 130048   ;;  %s3038_s20 = smov 111   ;;  %s3810_s6 = inlined_call_operand.vmem [shape: f32[64,18], index: 6, kind: input, shape index: {}]   ;;  %s3811_s0 = inlined_call_operand.vmem [shape: f32[16,64], index: 0, kind: input, shape index: {}]   ;;  %s3812_s3 = inlined_call_operand.vmem [shape: s32[48,1], index: 3, kind: input, shape index: {}]   ;;  %s3813_s4 = inlined_call_operand.vmem [shape: s32[48,1], index: 4, kind: input, shape index: {}]   ;;  %s3814_s7 = inlined_call_operand.vmem [shape: f32[16,1], index: 7, kind: input, shape index: {}]   ;;  %s3815_s2 = inlined_call_operand.vmem [shape: f32[48,16], index: 2, kind: input, shape index: {}]   ;;  %s3816_s5 = inlined_call_operand.vmem [shape: s32[1,48], index: 5, kind: input, shape index: {}]   ;;  %s3817_s9 = inlined_call_operand.vmem [shape: f32[16,18], index: 9, kind: input, shape index: {}]   ;;  %s3818_s8 = inlined_call_operand.vmem [shape: f32[1,16], index: 8, kind: input, shape index: {}]   ;;  %s3819_s10 = inlined_call_operand.vmem [shape: f32[16,1], index: 10, kind: input, shape index: {}]   ;;  %s3820_s12 = inlined_call_operand.vmem [shape: f32[16,16], index: 12, kind: input, shape index: {}]   ;;  %s3821_s13 = inlined_call_operand.vmem [shape: f32[16,16], index: 13, kind: input, shape index: {}]   ;;  %s3822_s11 = inlined_call_operand.vmem [shape: f32[1,16], index: 11, kind: input, shape index: {}]   ;;  %s3823_s14 = inlined_call_operand.vmem [shape: f32[16,16], index: 14, kind: input, shape index: {}]   ;;  %s3824_s1 = inlined_call_operand.vmem [shape: f32[32,16], index: 1, kind: input, shape index: {}]   ;;  %s3825_s16 = inlined_call_operand.vmem [shape: f32[16,128], index: 16, kind: input, shape index: {}]   ;;  %s3826_s15 = inlined_call_operand.vmem [shape: f32[1,16], index: 15, kind: input, shape index: {}]   ;;  %s3827_s17 = inlined_call_operand.vmem [shape: f32[1,128], index: 17, kind: input, shape index: {}]   ;;  %s3828_s18 = inlined_call_operand.vmem [shape: f32[32,128], index: 18, kind: output, shape index: {}]  }
   0x1   :  { %3832 = sst [smem:[#allocation2_spill]] %s3810_s6  ;;  %2942 = vset.pattern.permute.xlu0 %v3036_v3  ;;  %2943 = vset.pattern.permute.xlu1 %v3036_v3  ;;  %v94_v20 = vld [vmem:[%s3813_s4] sm:$0xff]  ;;  %v95_v21 = vld [vmem:[%s3813_s4 + $0x8] sm:$0xff]  ;;  %v96_v23 = vld [vmem:[%s3813_s4 + $0x10] sm:$0xff]  ;;  %v3037_v30 = vmov 0.0  }
   0x2   :  { %3833 = sst [smem:[#allocation3_spill]] %s3811_s0  ;;  %s3835_s29 = sld [smem:[#allocation2_spill]]  ;;  %v97_v24 = vld [vmem:[%s3813_s4 + $0x18] sm:$0xff]  ;;  %v99_v25 = vld [vmem:[%s3813_s4 + $0x28] sm:$0xff]  ;;  %v3202_v27 = vand.u32 127, %v59_v26  ;;  %v492_v36 = vld [vmem:[%s3814_s7] sm:$0xff] }
   0x3   :  { %3834 = sst [smem:[#allocation4_spill]] %s3812_s3  ;;  %s3836_s27 = sld [smem:[#allocation3_spill]]  ;;  %v493_v37 = vld [vmem:[%s3814_s7 + $0x8] sm:$0xff]  ;;  %v98_v44 = vld [vmem:[%s3813_s4 + $0x20] sm:$0xff]  ;;  %v3277_v53 = vld [vmem:[%s3815_s2 + $0x10] sm:$0xff] }
   0x4   :  { %s3837_s6 = sld [smem:[#allocation4_spill]]  ;;  %v2859_v42 = vpack.c.bf16 %v493_v37, %v492_v36  ;;  %v3263_v51 = vld [vmem:[%s3815_s2] sm:$0xff]  ;;  %v3272_v52 = vld [vmem:[%s3815_s2 + $0x8] sm:$0xff]  ;;  %v3286_v54 = vld [vmem:[%s3815_s2 + $0x18] sm:$0xff] }
   0x5   :  { %v3291_v55 = vld [vmem:[%s3815_s2 + $0x20] sm:$0xff]  ;;  %v3300_v56 = vld [vmem:[%s3815_s2 + $0x28] sm:$0xff]  ;;  %s3039_s2 = smov 16  }
   0x8   :  { %v167_v0 = vld [vmem:[%s3835_s29] sm:$0xff]  ;;  %v168_v1 = vld [vmem:[%s3835_s29 + $0x8] sm:$0xff]  ;;  %v169_v2 = vld [vmem:[%s3835_s29 + $0x10] sm:$0xff] }
   0x9   :  { %v2835_v4 = vpack.c.bf16 %v168_v1, %v167_v0  ;;  %v170_v5 = vld [vmem:[%s3835_s29 + $0x18] sm:$0xff]  ;;  %v171_v7 = vld [vmem:[%s3835_s29 + $0x20] sm:$0xff]  ;;  %v172_v8 = vld [vmem:[%s3835_s29 + $0x28] sm:$0xff] }
   0xa   :  { %v2839_v6 = vpack.c.bf16 %v170_v5, %v169_v2  ;;  %v165_v9 = vld [vmem:[%s3836_s27] sm:$0xff]  ;;  %v2843_v12 = vpack.c.bf16 %v172_v8, %v171_v7  ;;  %v65_v13 = vld [vmem:[%s3837_s6 + $0x8] sm:$0xff]  ;;  %v173_v14 = vld [vmem:[%s3835_s29 + $0x30] sm:$0xff] }
   0xb   :  { %2836 = vmatprep.subr.bf16.mxu0 %v2835_v4  ;;  %2663 = vmatprep.mubr.msk.f32.mxu0 %vm175_vm0, %v165_v9  ;;  %v64_v10 = vld [vmem:[%s3837_s6] sm:$0xff]  ;;  %v174_v15 = vld [vmem:[%s3835_s29 + $0x38] sm:$0xff]  ;;  %v69_v16 = vld [vmem:[%s3837_s6 + $0x28] sm:$0xff] }
   0xc   :  { %2838 = vmatpush3.bf16.msra.mxu0 %v2835_v4  ;;  %71 = vperm.xlu0 %2942, %v64_v10   ;;  %v68_v11 = vld [vmem:[%s3837_s6 + $0x20] sm:$0xff]  ;;  %v2847_v17 = vpack.c.bf16 %v174_v15, %v173_v14  ;;  %v66_v18 = vld [vmem:[%s3837_s6 + $0x10] sm:$0xff]  ;;  %v67_v19 = vld [vmem:[%s3837_s6 + $0x18] sm:$0xff] }
   0xd   :  { %2840 = vmatprep.subr.bf16.mxu0 %v2839_v6  ;;  %83 = vperm.xlu1 %2943, %v68_v11   ;;  %v166_v22 = vld [vmem:[%s3836_s27 + $0x8] sm:$0xff] }
  0x10   :  { %2842 = vmatpush3.bf16.msra.mxu0 %v2839_v6  ;;  %74 = vperm.xlu0 %2942, %v65_v13  }
  0x11   :  { %2844 = vmatprep.subr.bf16.mxu0 %v2843_v12  ;;  %86 = vperm.xlu1 %2943, %v69_v16  }
  0x14   :  { %2846 = vmatpush3.bf16.msra.mxu0 %v2843_v12  ;;  %77 = vperm.xlu0 %2942, %v66_v18  }
  0x15   :  { %2848 = vmatprep.subr.bf16.mxu0 %v2847_v17  ;;  %80 = vperm.xlu1 %2943, %v67_v19   ;;  %v3040_v19 = vmov 16  }
  0x18   :  { %2850 = vmatpush3.bf16.msra.mxu0 %v2847_v17  ;;  %101 = vperm.xlu0 %2942, %v94_v20  }
  0x19   :  { %104 = vperm.xlu1 %2943, %v95_v21  }
  0x1b   :  { %2664 = vmatmul.mubr.msk.f32.vlgmr.msra.gmra.mrb[0].mxu0 %vm175_vm0, %v166_v22 }
  0x1c   :  { %107 = vperm.xlu0 %2942, %v96_v23  }
  0x20   :  { %110 = vperm.xlu0 %2942, %v97_v24  }
  0x24   :  { %116 = vperm.xlu0 %2942, %v99_v25  }
  0x28   :  { %2949 = vset.pattern.permute.xlu0 %v3040_v19 }
  0x8b   :  { %v72_v28 = vpop.permute.xlu0 %71 }
  0x8c   :  { %vm88_vm2 = vcmp.eq.s32.totalorder %v72_v28, %v3202_v27  ;;  %v84_v29 = vpop.permute.xlu1 %83 }
  0x8d   :  { %v3206_v31 = vsel %vm88_vm2, 1.0, %v3037_v30  ;;  %vm92_vm3 = vcmp.eq.s32.totalorder %v84_v29, %v3202_v27 }
  0x8e   :  { %2670 = vmatprep.mubr.msk.f32.mxu0 %vm257_vm1, %v3206_v31  ;;  %v3212_v32 = vsel %vm92_vm3, 1.0, %v3037_v30 }
  0x8f   :  { %2676 = vmatprep.mubr.msk.f32.mxu1 %vm257_vm1, %v3212_v32  ;;  %v75_v33 = vpop.permute.xlu0 %74 }
  0x90   :  { %v87_v35 = vpop.permute.xlu1 %86  ;;  %vm89_vm4 = vcmp.eq.s32.totalorder %v75_v33, %v3202_v27 }
  0x91   :  { %vm93_vm6 = vcmp.eq.s32.totalorder %v87_v35, %v3202_v27  ;;  %v3234_v45 = vsel %vm89_vm4, 1.0, %v3037_v30 }
  0x92   :  { %v3240_v48 = vsel %vm93_vm6, 1.0, %v3037_v30  ;;  %vm912_vm6 = vcmask 392192  }
  0x93   :  { %v78_v34 = vpop.permute.xlu0 %77 }
  0x94   :  { %vm90_vm5 = vcmp.eq.s32.totalorder %v78_v34, %v3202_v27  ;;  %v81_v46 = vpop.permute.xlu1 %80 }
  0x95   :  { %v3237_v47 = vsel %vm90_vm5, 1.0, %v3037_v30  ;;  %vm91_vm8 = vcmp.eq.s32.totalorder %v81_v46, %v3202_v27 }
  0x96   :  { %v3252_v50 = vsel %vm91_vm8, 1.0, %v3037_v30 }
  0x97   :  { %v3224_v43 = vpop.permute.xlu0 %101 }
  0x98   :  { %vm118_vm7 = vcmp.eq.s32.totalorder %v3224_v43, %v3202_v27  ;;  %v3304_v57 = vpop.permute.xlu1 %104 }
  0x99   :  { %v3247_v49 = vsel %vm118_vm7, 1.0, %v3037_v30  ;;  %vm119_vm9 = vcmp.eq.s32.totalorder %v3304_v57, %v3202_v27 }
  0x9a   :  { %v3318_v0 = vsel %vm119_vm9, 1.0, %v3037_v30 }
  0x9b   :  { %v3306_v61 = vpop.permute.xlu0 %107 }
  0x9c   :  { %vm120_vm10 = vcmp.eq.s32.totalorder %v3306_v61, %v3202_v27 }
  0x9d   :  { %v3324_v1 = vsel %vm120_vm10, 1.0, %v3037_v30 }
  0x9f   :  { %v3312_v63 = vpop.permute.xlu0 %110 }
  0xa0   :  { %vm121_vm11 = vcmp.eq.s32.totalorder %v3312_v63, %v3202_v27 }
  0xa1   :  { %v3336_v2 = vsel %vm121_vm11, 1.0, %v3037_v30 }
  0xa3   :  { %v3340_v3 = vpop.permute.xlu0 %116 }
  0xa4   :  { %vm123_vm12 = vcmp.eq.s32.totalorder %v3340_v3, %v3202_v27 }
  0xa5   :  { %v3358_v6 = vsel %vm123_vm12, 1.0, %v3037_v30 }
  0xee   :  { %v2665_v38 = vpop.f32.mrb[0].mxu0 }
  0xef   :  { %v248_v39 = vpop.f32.mrb[1].mxu0 }
  0xf0   :  { %v2944_v40 = vpack.i.bf16 %v2665_v38, %v248_v39  ;;  %v2851_v41 = vpack.c.bf16 %v2665_v38, %v248_v39 }
  0xf2   :  { %2945 = vrot.lane.b32.xlu1 %v2944_v40, %s3038_s20  ;;  %2852 = vmatprep.subr.bf16.mxu0 %v2851_v41 }
  0xf3   :  { %2927 = vmatprep.subr.bf16.mxu1 %v2851_v41  ;;  %2854 = vmatpush3.bf16.msra.mxu0 %v2851_v41 }
  0xf4   :  { %2928 = vmatpush3.bf16.msra.mxu1 %v2851_v41  ;;  %2860 = vmatprep.subr.bf16.mxu0 %v2859_v42 }
  0xf6   :  { %113 = vperm.xlu1 %2943, %v98_v44   ;;  %2671 = vmatmul.mubr.msk.f32.vlgmr.msra.gmra.mrb[2].mxu0 %vm257_vm1, %v3234_v45 }
  0xf7   :  { %2673 = vmatprep.mubr.msk.f32.mxu0 %vm257_vm1, %v3237_v47  ;;  %2677 = vmatmul.mubr.msk.f32.vlgmr.msra.gmra.mrb[0].mxu1 %vm257_vm1, %v3240_v48 }
  0xf8   :  { %2683 = vmatprep.mubr.msk.f32.mxu1 %vm257_vm1, %v3247_v49  ;;  %2862 = vmatpush3.bf16.msra.mxu0 %v2859_v42 }
  0xfa   :  { %2674 = vmatmul.mubr.msk.f32.gmra.mrb[4].mxu0 %vm257_vm1, %v3252_v50  ;;  %2950 = vset.pattern.permute.xlu1 %v3040_v19 }
  0xfb   :  { %2696 = vmatprep.mubr.msk.f32.mxu0 %vm257_vm1, %v3263_v51 }
  0xfe   :  { %2697 = vmatmul.mubr.msk.f32.vlgmr.msra.gmra.mrb[6].mxu0 %vm257_vm1, %v3272_v52 }
  0xff   :  { %2699 = vmatprep.mubr.msk.f32.mxu0 %vm257_vm1, %v3277_v53 }
 0x102   :  { %2700 = vmatmul.mubr.msk.f32.gmra.mrb[8].mxu0 %vm257_vm1, %v3286_v54 }
 0x103   :  { %2702 = vmatprep.mubr.msk.f32.mxu0 %vm257_vm1, %v3291_v55 }
 0x106   :  { %2703 = vmatmul.mubr.msk.f32.gmra.mrb[10].mxu0 %vm257_vm1, %v3300_v56 }
 0x164   :  { %v2946_v58 = vpop.permute.xlu1 %2945 }
 0x165   :  { %v2948_v59 = vunpack.i.h.bf16 %v2946_v58  ;;  %v2947_v60 = vunpack.i.l.bf16 %v2946_v58 }
 0x167   :  { %v2855_v62 = vpack.c.bf16 %v2948_v59, %v2947_v60 }
 0x169   :  { %2856 = vmatprep.subr.bf16.mxu1 %v2855_v62 }
 0x16a   :  { %2858 = vmatpush3.bf16.msra.mxu1 %v2855_v62 }
 0x16d   :  { %2684 = vmatmul.mubr.msk.f32.vlgmr.msra.gmra.mrb[2].mxu1 %vm257_vm1, %v3318_v0 }
 0x16e   :  { %2686 = vmatprep.mubr.msk.f32.mxu1 %vm257_vm1, %v3324_v1 }
 0x171   :  { %2687 = vmatmul.mubr.msk.f32.gmra.mrb[4].mxu1 %vm257_vm1, %v3336_v2 }
 0x175   :  { %v3344_v4 = vpop.permute.xlu1 %113 }
 0x176   :  { %vm122_vm13 = vcmp.eq.s32.totalorder %v3344_v4, %v3202_v27 }
 0x177   :  { %v3352_v5 = vsel %vm122_vm13, 1.0, %v3037_v30 }
 0x178   :  { %2689 = vmatprep.mubr.msk.f32.mxu1 %vm257_vm1, %v3352_v5 }
 0x179   :  { %2690 = vmatmul.mubr.msk.f32.gmra.mrb[6].mxu1 %vm257_vm1, %v3358_v6 }
 0x1c9   :  { %v3364_v7 = vpop.f32.mrb[2].mxu0 }
 0x1ca   :  { %v3366_v8 = vpop.f32.mrb[3].mxu0  ;;  %v3368_v9 = vpop.f32.mrb[0].mxu1 }
 0x1cb   :  { %v3370_v10 = vpop.f32.mrb[1].mxu1 }
 0x1cd   :  { %v3372_v11 = vpop.f32.mrb[4].mxu0 }
 0x1ce   :  { %v3374_v12 = vpop.f32.mrb[5].mxu0 }
 0x1d1   :  { %v2698_v13 = vpop.f32.mrb[6].mxu0 }
 0x1d2   :  { %v578_v14 = vpop.f32.mrb[7].mxu0  ;;  %645 = vrot.lane.b32.xlu0 %v2698_v13, %s3039_s2 }
 0x1d3   :  { %643 = vrot.lane.b32.xlu1 %v578_v14, %s3039_s2 }
 0x1d5   :  { %v2701_v15 = vpop.f32.mrb[8].mxu0 }
 0x1d6   :  { %v588_v16 = vpop.f32.mrb[9].mxu0 }
 0x1d9   :  { %v2704_v17 = vpop.f32.mrb[10].mxu0 }
 0x1da   :  { %653 = vrot.lane.b32.xlu0 %v2704_v17, %s3039_s2  ;;  %v598_v18 = vpop.f32.mrb[11].mxu0 }
 0x1db   :  { %651 = vrot.lane.b32.xlu1 %v598_v18, %s3039_s2 }
 0x240   :  { %v2685_v20 = vpop.f32.mrb[2].mxu1 }
 0x241   :  { %v463_v21 = vpop.f32.mrb[3].mxu1  ;;  %615 = vrot.lane.b32.xlu0 %v2685_v20, %s3039_s2 }
 0x242   :  { %613 = vrot.lane.b32.xlu1 %v463_v21, %s3039_s2 }
 0x244   :  { %v2688_v22 = vpop.f32.mrb[4].mxu1  ;;  %v646_v28 = vpop.permute.xlu0 %645 }
 0x245   :  { %v473_v23 = vpop.f32.mrb[5].mxu1  ;;  %619 = vrot.lane.b32.xlu0 %v2688_v22, %s3039_s2  ;;  %v644_v29 = vpop.permute.xlu1 %643 }
 0x246   :  { %617 = vrot.lane.b32.xlu1 %v473_v23, %s3039_s2 }
 0x24c   :  { %v2691_v24 = vpop.f32.mrb[6].mxu1  ;;  %v654_v33 = vpop.permute.xlu0 %653 }
 0x24d   :  { %v483_v25 = vpop.f32.mrb[7].mxu1  ;;  %623 = vrot.lane.b32.xlu0 %v2691_v24, %s3039_s2  ;;  %v652_v34 = vpop.permute.xlu1 %651 }
 0x24e   :  { %621 = vrot.lane.b32.xlu1 %v483_v25, %s3039_s2 }
 0x251   :  { %649 = vrot.lane.b32.xlu0 %v2701_v15, %s3039_s2 }
 0x252   :  { %647 = vrot.lane.b32.xlu1 %v588_v16, %s3039_s2 }
 0x2b3   :  { %v616_v35 = vpop.permute.xlu0 %615 }
 0x2b4   :  { %v632_v36 = vadd.f32 %v3364_v7, %v616_v35  ;;  %v614_v37 = vpop.permute.xlu1 %613 }
 0x2b5   :  { %v631_v38 = vadd.f32 %v614_v37, %v3366_v8 }
 0x2b6   :  { %v662_v39 = vadd.f32 %v646_v28, %v632_v36 }
 0x2b7   :  { %v661_v40 = vadd.f32 %v644_v29, %v631_v38  ;;  %v620_v46 = vpop.permute.xlu0 %619 }
 0x2b8   :  { %vm668_vm14 = vcmp.ge.f32.partialorder %v662_v39, 0.0  ;;  %v674_v41 = vmul.f32 0.2, %v662_v39  ;;  %v618_v59 = vpop.permute.xlu1 %617  ;;  %v634_v19 = vadd.f32 %v3372_v11, %v620_v46 }
 0x2b9   :  { %vm667_vm15 = vcmp.ge.f32.partialorder %v661_v40, 0.0  ;;  %v673_v42 = vmul.f32 0.2, %v661_v40  ;;  %v633_v16 = vadd.f32 %v618_v59, %v3374_v12 }
 0x2ba   :  { %v3390_v44 = vsel %vm668_vm14, %v662_v39, %v674_v41 }
 0x2bb   :  { %692 = vperm.xlu0 %2949, %v3390_v44   ;;  %v3393_v58 = vsel %vm667_vm15, %v661_v40, %v673_v42 }
 0x2bc   :  { %687 = vperm.xlu1 %2950, %v3393_v58  }
 0x2bf   :  { %v624_v60 = vpop.permute.xlu0 %623 }
 0x2c0   :  { %v636_v62 = vadd.f32 %v3368_v9, %v624_v60  ;;  %v622_v13 = vpop.permute.xlu1 %621 }
 0x2c1   :  { %v635_v14 = vadd.f32 %v622_v13, %v3370_v10 }
 0x2c2   :  { %v666_v15 = vadd.f32 %v654_v33, %v636_v62 }
 0x2c3   :  { %v665_v17 = vadd.f32 %v652_v34, %v635_v14  ;;  %v650_v18 = vpop.permute.xlu0 %649 }
 0x2c4   :  { %v648_v20 = vpop.permute.xlu1 %647  ;;  %vm672_vm0 = vcmp.ge.f32.partialorder %v666_v15, 0.0  ;;  %v678_v21 = vmul.f32 0.2, %v666_v15  ;;  %v664_v23 = vadd.f32 %v650_v18, %v634_v19 }
 0x2c5   :  { %v663_v22 = vadd.f32 %v648_v20, %v633_v16  ;;  %v677_v25 = vmul.f32 0.2, %v665_v17  ;;  %vm671_vm3 = vcmp.ge.f32.partialorder %v665_v17, 0.0 }
 0x2c6   :  { %v3400_v24 = vsel %vm672_vm0, %v666_v15, %v678_v21  ;;  %v676_v33 = vmul.f32 0.2, %v664_v23  ;;  %vm670_vm4 = vcmp.ge.f32.partialorder %v664_v23, 0.0 }
 0x2c7   :  { %v675_v28 = vmul.f32 0.2, %v663_v22  ;;  %712 = vperm.xlu1 %2950, %v3400_v24   ;;  %vm669_vm2 = vcmp.ge.f32.partialorder %v663_v22, 0.0  ;;  %v3406_v34 = vsel %vm671_vm3, %v665_v17, %v677_v25 }
 0x2c8   :  { %v3409_v35 = vsel %vm670_vm4, %v664_v23, %v676_v33 }
 0x2c9   :  { %v3403_v29 = vsel %vm669_vm2, %v663_v22, %v675_v28 }
 0x2ca   :  { %697 = vperm.xlu0 %2949, %v3403_v29  }
 0x2cb   :  { %707 = vperm.xlu1 %2950, %v3406_v34  }
 0x2cf   :  { %702 = vperm.xlu1 %2950, %v3409_v35  }
 0x33a   :  { %v693_v37 = vpop.permute.xlu0 %692 }
 0x33b   :  { %v688_v36 = vpop.permute.xlu1 %687  ;;  %v716_v46 = vsel %vm119_vm9, %v693_v37, -1e+30 }
 0x33c   :  { %v715_v39 = vsel %vm118_vm7, %v688_v36, -1e+30  ;;  %v722_v16 = vsel %vm257_vm1, %v716_v46, -inf }
 0x33d   :  { %v721_v60 = vsel %vm257_vm1, %v715_v39, -inf }
 0x346   :  { %v713_v38 = vpop.permute.xlu1 %712 }
 0x347   :  { %v720_v40 = vsel %vm123_vm12, %v713_v38, -1e+30 }
 0x348   :  { %v727_v62 = vsel %vm257_vm1, %v720_v40, -inf }
 0x349   :  { %v698_v41 = vpop.permute.xlu0 %697  ;;  %v728_v18 = vmax.f32 %v722_v16, %v727_v62 }
 0x34a   :  { %v708_v42 = vpop.permute.xlu1 %707  ;;  %v717_v14 = vsel %vm120_vm10, %v698_v41, -1e+30 }
 0x34b   :  { %v719_v59 = vsel %vm122_vm13, %v708_v42, -1e+30  ;;  %v723_v20 = vsel %vm257_vm1, %v717_v14, -inf }
 0x34c   :  { %v725_v13 = vsel %vm257_vm1, %v719_v59, -inf }
 0x34d   :  { %v726_v15 = vmax.f32 %v721_v60, %v725_v13 }
 0x34e   :  { %v703_v17 = vpop.permute.xlu1 %702 }
 0x34f   :  { %v718_v19 = vsel %vm121_vm11, %v703_v17, -1e+30  ;;  %v729_v22 = vmax.f32 %v726_v15, %v728_v18 }
 0x350   :  { %v724_v21 = vsel %vm257_vm1, %v718_v19, -inf }
 0x351   :  { %v730_v23 = vmax.f32 %v723_v20, %v724_v21 }
 0x353   :  { %v731_v25 = vmax.f32 %v729_v22, %v730_v23 }
 0x355   :  { %v732_v28 = vrot.slane %v731_v25, 4 }
 0x357   :  { %v733_v33 = vmax.f32 %v731_v25, %v732_v28 }
 0x359   :  { %v734_v36 = vrot.slane %v733_v33, 2 }
 0x35b   :  { %v735_v37 = vmax.f32 %v733_v33, %v734_v36 }
 0x35d   :  { %v736_v38 = vrot.slane %v735_v37, 1 }
 0x35f   :  { %v737_v39 = vmax.f32 %v735_v37, %v736_v38 }
 0x361   :  { %v739_v40 = vmul.f32 %v3318_v0, %v737_v39  ;;  %v738_v41 = vmul.f32 %v3247_v49, %v737_v39  ;;  %v742_v59 = vmul.f32 %v3352_v5, %v737_v39  ;;  %v740_v60 = vmul.f32 %v3324_v1, %v737_v39 }
 0x362   :  { %v741_v14 = vmul.f32 %v3336_v2, %v737_v39  ;;  %v743_v16 = vmul.f32 %v3358_v6, %v737_v39 }
 0x363   :  { %v747_v42 = vsel %vm257_vm1, %v739_v40, 0.0  ;;  %v744_v46 = vsel %vm257_vm1, %v738_v41, 0.0  ;;  %v756_v62 = vsel %vm257_vm1, %v742_v59, 0.0  ;;  %v750_v13 = vsel %vm257_vm1, %v740_v60, 0.0 }
 0x364   :  { %748 = vadd.xlane.f32.xlu1 %v747_v42  ;;  %745 = vadd.xlane.f32.xlu0 %v744_v46  ;;  %v753_v15 = vsel %vm257_vm1, %v741_v14, 0.0  ;;  %v759_v17 = vsel %vm257_vm1, %v743_v16, 0.0 }
 0x368   :  { %757 = vadd.xlane.f32.xlu1 %v756_v62  ;;  %751 = vadd.xlane.f32.xlu0 %v750_v13 }
 0x36c   :  { %754 = vadd.xlane.f32.xlu0 %v753_v15 }
 0x370   :  { %760 = vadd.xlane.f32.xlu0 %v759_v17 }
 0x3f1   :  { %v749_v18 = vpop.xlane.xlu1 %748  ;;  %v746_v19 = vpop.xlane.xlu0 %745 }
 0x3f2   :  { %v763_v20 = vsub.f32 %v3390_v44, %v749_v18  ;;  %v762_v21 = vsub.f32 %v3393_v58, %v746_v19 }
 0x3f4   :  { %v770_v22 = vmul.f32 1.442695, %v763_v20  ;;  %v768_v23 = vmul.f32 1.442695, %v762_v21 }
 0x3f5   :  { %v758_v25 = vpop.xlane.xlu1 %757  ;;  %v752_v28 = vpop.xlane.xlu0 %751 }
 0x3f6   :  { %2956 = vpow2.f32 %v770_v22  ;;  %v766_v33 = vsub.f32 %v3406_v34, %v758_v25  ;;  %v764_v36 = vsub.f32 %v3403_v29, %v752_v28 }
 0x3f7   :  { %2958 = vpow2.f32 %v768_v23 }
 0x3f8   :  { %v776_v37 = vmul.f32 1.442695, %v766_v33  ;;  %v772_v38 = vmul.f32 1.442695, %v764_v36 }
 0x3f9   :  { %v755_v39 = vpop.xlane.xlu0 %754 }
 0x3fa   :  { %2960 = vpow2.f32 %v776_v37  ;;  %v765_v40 = vsub.f32 %v3409_v35, %v755_v39 }
 0x3fb   :  { %2962 = vpow2.f32 %v772_v38 }
 0x3fc   :  { %v774_v44 = vmul.f32 1.442695, %v765_v40 }
 0x3fd   :  { %v761_v41 = vpop.xlane.xlu0 %760 }
 0x3fe   :  { %2964 = vpow2.f32 %v774_v44  ;;  %v767_v58 = vsub.f32 %v3400_v24, %v761_v41 }
 0x400   :  { %v3454_v42 = vpop.eup %2956  ;;  %v778_v46 = vmul.f32 1.442695, %v767_v58 }
 0x401   :  { %v3456_v59 = vpop.eup %2958  ;;  %787 = vperm.xlu0 %2949, %v3454_v42  }
 0x402   :  { %2966 = vpow2.f32 %v778_v46  ;;  %782 = vperm.xlu1 %2950, %v3456_v59  }
 0x404   :  { %v3460_v29 = vpop.eup %2960 }
 0x405   :  { %v3462_v34 = vpop.eup %2962  ;;  %802 = vperm.xlu0 %2949, %v3460_v29  }
 0x406   :  { %792 = vperm.xlu1 %2950, %v3462_v34  }
 0x408   :  { %v3466_v35 = vpop.eup %2964 }
 0x40a   :  { %797 = vperm.xlu1 %2950, %v3466_v35  }
 0x40c   :  { %v3469_v24 = vpop.eup %2966 }
 0x40e   :  { %807 = vperm.xlu1 %2950, %v3469_v24  }
 0x480   :  { %v788_v60 = vpop.permute.xlu0 %787 }
 0x481   :  { %v783_v62 = vpop.permute.xlu1 %782  ;;  %v811_v14 = vmul.f32 %v3318_v0, %v788_v60 }
 0x482   :  { %v810_v13 = vmul.f32 %v3247_v49, %v783_v62 }
 0x483   :  { %v817_v17 = vsel %vm257_vm1, %v811_v14, 0.0 }
 0x484   :  { %v816_v16 = vsel %vm257_vm1, %v810_v13, 0.0  ;;  %v803_v19 = vpop.permute.xlu0 %802 }
 0x485   :  { %v793_v15 = vpop.permute.xlu1 %792  ;;  %v818_v21 = vadd.f32 %v817_v17, %v816_v16  ;;  %v814_v23 = vmul.f32 %v3352_v5, %v803_v19 }
 0x486   :  { %v812_v18 = vmul.f32 %v3324_v1, %v793_v15 }
 0x487   :  { %v823_v38 = vsel %vm257_vm1, %v814_v23, 0.0 }
 0x488   :  { %v819_v20 = vsel %vm257_vm1, %v812_v18, 0.0 }
 0x489   :  { %v798_v22 = vpop.permute.xlu1 %797  ;;  %v820_v28 = vadd.f32 %v819_v20, %v818_v21 }
 0x48a   :  { %v813_v25 = vmul.f32 %v3336_v2, %v798_v22 }
 0x48c   :  { %v821_v33 = vsel %vm257_vm1, %v813_v25, 0.0 }
 0x48d   :  { %v822_v36 = vadd.f32 %v821_v33, %v820_v28  ;;  %v808_v37 = vpop.permute.xlu1 %807 }
 0x48e   :  { %v815_v39 = vmul.f32 %v3358_v6, %v808_v37 }
 0x48f   :  { %v824_v40 = vadd.f32 %v823_v38, %v822_v36 }
 0x490   :  { %v825_v44 = vsel %vm257_vm1, %v815_v39, 0.0 }
 0x491   :  { %v826_v41 = vadd.f32 %v825_v44, %v824_v40 }
 0x493   :  { %v827_v58 = vrot.slane %v826_v41, 4 }
 0x495   :  { %v828_v46 = vadd.f32 %v827_v58, %v826_v41 }
 0x497   :  { %v829_v60 = vrot.slane %v828_v46, 2 }
 0x499   :  { %v830_v62 = vadd.f32 %v829_v60, %v828_v46 }
 0x49b   :  { %v831_v13 = vrot.slane %v830_v62, 1 }
 0x49d   :  { %v832_v14 = vadd.f32 %v831_v13, %v830_v62 }
 0x49f   :  { %v834_v15 = vmul.f32 %v3318_v0, %v832_v14  ;;  %v833_v16 = vmul.f32 %v3247_v49, %v832_v14  ;;  %v837_v19 = vmul.f32 %v3352_v5, %v832_v14  ;;  %v835_v20 = vmul.f32 %v3324_v1, %v832_v14 }
 0x4a0   :  { %v836_v23 = vmul.f32 %v3336_v2, %v832_v14  ;;  %v838_v28 = vmul.f32 %v3358_v6, %v832_v14 }
 0x4a1   :  { %v842_v17 = vsel %vm257_vm1, %v834_v15, 0.0  ;;  %v839_v18 = vsel %vm257_vm1, %v833_v16, 0.0  ;;  %v851_v21 = vsel %vm257_vm1, %v837_v19, 0.0  ;;  %v845_v22 = vsel %vm257_vm1, %v835_v20, 0.0  ;;  %v2462_v20 = vld [vmem:[%s3816_s5] ss:$0 sm:$0xff] }
 0x4a2   :  { %843 = vadd.xlane.f32.xlu1 %v842_v17  ;;  %840 = vadd.xlane.f32.xlu0 %v839_v18  ;;  %v848_v25 = vsel %vm257_vm1, %v836_v23, 0.0  ;;  %v854_v33 = vsel %vm257_vm1, %v838_v28, 0.0 }
 0x4a6   :  { %852 = vadd.xlane.f32.xlu1 %v851_v21  ;;  %846 = vadd.xlane.f32.xlu0 %v845_v22 }
 0x4aa   :  { %849 = vadd.xlane.f32.xlu0 %v848_v25 }
 0x4ae   :  { %855 = vadd.xlane.f32.xlu0 %v854_v33 }
 0x52f   :  { %v844_v36 = vpop.xlane.xlu1 %843  ;;  %v841_v37 = vpop.xlane.xlu0 %840 }
 0x530   :  { %2968 = vrcp.f32 %v844_v36 }
 0x531   :  { %2970 = vrcp.f32 %v841_v37 }
 0x533   :  { %v853_v38 = vpop.xlane.xlu1 %852  ;;  %v847_v39 = vpop.xlane.xlu0 %846 }
 0x534   :  { %2972 = vrcp.f32 %v853_v38 }
 0x535   :  { %2974 = vrcp.f32 %v847_v39 }
 0x537   :  { %v850_v40 = vpop.xlane.xlu0 %849 }
 0x538   :  { %2976 = vrcp.f32 %v850_v40 }
 0x53a   :  { %v2969_v44 = vpop.eup %2968 }
 0x53b   :  { %v2971_v41 = vpop.eup %2970  ;;  %v856_v58 = vpop.xlane.xlu0 %855  ;;  %v860_v46 = vmul.f32 %v2969_v44, %v3454_v42 }
 0x53c   :  { %2978 = vrcp.f32 %v856_v58  ;;  %v858_v60 = vmul.f32 %v2971_v41, %v3456_v59  ;;  %v62_v59 = vshrl.u32 %v59_v26, 7 }
 0x53d   :  { %876 = vperm.xlu0 %2949, %v860_v46  }
 0x53e   :  { %v2973_v62 = vpop.eup %2972  ;;  %871 = vperm.xlu1 %2950, %v858_v60   ;;  %v63_v19 = vadd.s32 8, %v62_v59  ;;  %vm153_vm5 = vcmp.eq.s32.totalorder %v2462_v20, %v62_v59 }
 0x53f   :  { %v2975_v13 = vpop.eup %2974  ;;  %v866_v14 = vmul.f32 %v2973_v62, %v3460_v29  ;;  %v3507_v29 = vsel %vm153_vm5, 1.0, %v3037_v30 }
 0x540   :  { %v862_v15 = vmul.f32 %v2975_v13, %v3462_v34  ;;  %vm154_vm8 = vcmp.eq.s32.totalorder %v2462_v20, %v63_v19  ;;  %2717 = vmatprep.mubr.msk.f32.mxu1 %vm912_vm6, %v3507_v29 }
 0x541   :  { %891 = vperm.xlu0 %2949, %v866_v14  }
 0x542   :  { %v2977_v16 = vpop.eup %2976  ;;  %881 = vperm.xlu1 %2950, %v862_v15  }
 0x543   :  { %v864_v17 = vmul.f32 %v2977_v16, %v3466_v35 }
 0x546   :  { %v2979_v18 = vpop.eup %2978  ;;  %886 = vperm.xlu1 %2950, %v864_v17  }
 0x547   :  { %v868_v42 = vmul.f32 %v2979_v18, %v3469_v24 }
 0x54a   :  { %896 = vperm.xlu1 %2950, %v868_v42  }
 0x5bc   :  { %v877_v34 = vpop.permute.xlu0 %876 }
 0x5bd   :  { %v872_v35 = vpop.permute.xlu1 %871  ;;  %v900_v24 = vmul.f32 %v3364_v7, %v877_v34 }
 0x5be   :  { %v899_v26 = vmul.f32 %v872_v35, %v3366_v8  ;;  %v3519_v8 = vsel %vm154_vm8, 1.0, %v3037_v30  ;;  %v2485_v30 = vld [vmem:[%s3818_s8] ss:$0 sm:$0xff] }
 0x5c0   :  { %v2863_v21 = vpack.c.bf16 %v900_v24, %v899_v26  ;;  %v892_v33 = vpop.permute.xlu0 %891 }
 0x5c1   :  { %v882_v22 = vpop.permute.xlu1 %881  ;;  %v903_v38 = vmul.f32 %v892_v33, %v3370_v10  ;;  %v1048_v10 = vld [vmem:[%s3817_s9] sm:$0xff] }
 0x5c2   :  { %2864 = vmatprep.subr.bf16.mxu1 %v2863_v21  ;;  %v901_v25 = vmul.f32 %v882_v22, %v3374_v12 }
 0x5c3   :  { %2866 = vmatpush3.bf16.msra.mxu1 %v2863_v21 }
 0x5c5   :  { %v887_v23 = vpop.permute.xlu1 %886 }
 0x5c6   :  { %v902_v28 = vmul.f32 %v3372_v11, %v887_v23 }
 0x5c8   :  { %v2867_v36 = vpack.c.bf16 %v902_v28, %v901_v25 }
 0x5c9   :  { %v897_v37 = vpop.permute.xlu1 %896 }
 0x5ca   :  { %v904_v39 = vmul.f32 %v3368_v9, %v897_v37  ;;  %2868 = vmatprep.subr.bf16.mxu1 %v2867_v36  ;;  %v1049_v9 = vld [vmem:[%s3817_s9 + $0x8] sm:$0xff] }
 0x5cb   :  { %2870 = vmatpush3.bf16.msra.mxu1 %v2867_v36  ;;  %v2875_v11 = vpack.c.bf16 %v1049_v9, %v1048_v10 }
 0x5cc   :  { %v2871_v7 = vpack.c.bf16 %v904_v39, %v903_v38 }
 0x5cd   :  { %2876 = vmatprep.subr.bf16.mxu0 %v2875_v11 }
 0x5ce   :  { %2872 = vmatprep.subr.bf16.mxu1 %v2871_v7  ;;  %2878 = vmatpush3.bf16.msra.mxu0 %v2875_v11 }
 0x5cf   :  { %2874 = vmatpush3.bf16.msra.mxu1 %v2871_v7 }
 0x5d2   :  { %2718 = vmatmul.mubr.msk.f32.vlgmr.msra.gmra.mrb[8].mxu1 %vm912_vm6, %v3519_v8 }
 0x5d3   :  { %2731 = vmatprep.mubr.msk.f32.mxu1 %vm257_vm1, %v3206_v31 }
 0x6a5   :  { %v2719_v12 = vpop.f32.mrb[8].mxu1 }
 0x6a6   :  { %v991_v40 = vadd.f32 %v2719_v12, %v2485_v30  ;;  %v985_v44 = vpop.f32.mrb[9].mxu1 }
 0x6a7   :  { %v986_v41 = vadd.f32 %v2485_v30, %v985_v44 }
 0x6a8   :  { %v995_v58 = vmul.f32 0.70710677, %v991_v40 }
 0x6a9   :  { %v994_v46 = vmul.f32 0.70710677, %v986_v41 }
 0x6aa   :  { %v997_v60 = vand.u32 2147483647, %v995_v58  ;;  %vm1037_vm14 = vcmp.ge.f32.partialorder %v995_v58, 0.0  ;;  %v1329_v58 = vld [vmem:[%s3819_s10] sm:$0xff] }
 0x6ab   :  { %v996_v62 = vand.u32 2147483647, %v994_v46  ;;  %vm1036_vm15 = vcmp.ge.f32.partialorder %v994_v46, 0.0  ;;  %v1330_v46 = vld [vmem:[%s3819_s10 + $0x8] sm:$0xff] }
 0x6ac   :  { %v999_v13 = vmul.f32 0.3275911, %v997_v60  ;;  %v1025_v17 = vsub.f32 0.0, %v997_v60 }
 0x6ad   :  { %v998_v14 = vmul.f32 0.3275911, %v996_v62  ;;  %v1024_v18 = vsub.f32 0.0, %v996_v62 }
 0x6ae   :  { %v1001_v15 = vadd.f32 1.0, %v999_v13  ;;  %v1027_v59 = vmul.f32 %v1025_v17, %v997_v60 }
 0x6af   :  { %v1000_v16 = vadd.f32 1.0, %v998_v14  ;;  %v1026_v34 = vmul.f32 %v1024_v18, %v996_v62 }
 0x6b0   :  { %2980 = vrcp.f32 %v1001_v15  ;;  %v1030_v26 = vmul.f32 1.442695, %v1027_v59 }
 0x6b1   :  { %2982 = vrcp.f32 %v1000_v16  ;;  %v1028_v23 = vmul.f32 1.442695, %v1026_v34  ;;  %v1042_v34 = vmul.f32 0.5, %v986_v41 }
 0x6b2   :  { %2984 = vpow2.f32 %v1030_v26 }
 0x6b3   :  { %2986 = vpow2.f32 %v1028_v23 }
 0x6ba   :  { %v2981_v42 = vpop.eup %2980 }
 0x6bb   :  { %v2983_v19 = vpop.eup %2982  ;;  %v1007_v20 = vmul.f32 1.0614054, %v2981_v42 }
 0x6bc   :  { %v1006_v35 = vmul.f32 1.0614054, %v2983_v19  ;;  %v2985_v12 = vpop.eup %2984 }
 0x6bd   :  { %v1009_v24 = vadd.f32 -1.4531521, %v1007_v20  ;;  %v2987_v60 = vpop.eup %2986 }
 0x6be   :  { %v1008_v21 = vadd.f32 -1.4531521, %v1006_v35 }
 0x6bf   :  { %v1011_v22 = vmul.f32 %v2981_v42, %v1009_v24  ;;  %v1043_v24 = vmul.f32 0.5, %v991_v40 }
 0x6c0   :  { %v1010_v25 = vmul.f32 %v2983_v19, %v1008_v21 }
 0x6c1   :  { %v1013_v28 = vadd.f32 1.4214138, %v1011_v22  ;;  %v2887_v22 = vpack.c.bf16 %v1330_v46, %v1329_v58 }
 0x6c2   :  { %v1012_v33 = vadd.f32 1.4214138, %v1010_v25 }
 0x6c3   :  { %v1015_v36 = vmul.f32 %v2981_v42, %v1013_v28 }
 0x6c4   :  { %v1014_v37 = vmul.f32 %v2983_v19, %v1012_v33 }
 0x6c5   :  { %v1017_v38 = vadd.f32 -0.28449672, %v1015_v36 }
 0x6c6   :  { %v1016_v39 = vadd.f32 -0.28449672, %v1014_v37 }
 0x6c7   :  { %v1019_v7 = vmul.f32 %v2981_v42, %v1017_v38 }
 0x6c8   :  { %v1018_v10 = vmul.f32 %v2983_v19, %v1016_v39 }
 0x6c9   :  { %v1021_v9 = vadd.f32 0.2548296, %v1019_v7 }
 0x6ca   :  { %v1020_v11 = vadd.f32 0.2548296, %v1018_v10 }
 0x6cb   :  { %v1023_v30 = vmul.f32 %v2981_v42, %v1021_v9 }
 0x6cc   :  { %v1022_v44 = vmul.f32 %v2983_v19, %v1020_v11 }
 0x6cd   :  { %v1033_v62 = vmul.f32 %v2985_v12, %v1023_v30 }
 0x6ce   :  { %v1032_v13 = vmul.f32 %v2987_v60, %v1022_v44 }
 0x6cf   :  { %v1035_v14 = vsub.f32 1.0, %v1033_v62 }
 0x6d0   :  { %v1034_v15 = vsub.f32 1.0, %v1032_v13 }
 0x6d1   :  { %v1039_v16 = vsub.f32 0.0, %v1035_v14 }
 0x6d2   :  { %v1038_v17 = vsub.f32 0.0, %v1034_v15 }
 0x6d3   :  { %v1041_v18 = vsel %vm1037_vm14, %v1035_v14, %v1039_v16 }
 0x6d4   :  { %v1045_v59 = vadd.f32 1.0, %v1041_v18  ;;  %v1040_v20 = vsel %vm1036_vm15, %v1034_v15, %v1038_v17 }
 0x6d5   :  { %v1044_v35 = vadd.f32 1.0, %v1040_v20 }
 0x6d6   :  { %v1047_v21 = vmul.f32 %v1045_v59, %v1043_v24 }
 0x6d7   :  { %v1046_v26 = vmul.f32 %v1044_v35, %v1042_v34 }
 0x6d9   :  { %2724 = vmatprep.mubr.msk.f32.mxu0 %vm257_vm1, %v1046_v26 }
 0x6da   :  { %2725 = vmatmul.mubr.msk.f32.vlgmr.msra.gmra.mrb[12].mxu0 %vm257_vm1, %v1047_v21 }
 0x6db   :  { %2744 = vmatprep.mubr.msk.f32.mxu0 %vm257_vm1, %v3247_v49 }
 0x7ad   :  { %v2726_v41 = vpop.f32.mrb[12].mxu0 }
 0x7ae   :  { %v1122_v42 = vpop.f32.mrb[13].mxu0 }
 0x7af   :  { %v2951_v40 = vpack.i.bf16 %v2726_v41, %v1122_v42  ;;  %v2879_v19 = vpack.c.bf16 %v2726_v41, %v1122_v42 }
 0x7b1   :  { %2952 = vrot.lane.b32.xlu0 %v2951_v40, %s3038_s20  ;;  %2880 = vmatprep.subr.bf16.mxu1 %v2879_v19 }
 0x7b2   :  { %2882 = vmatpush3.bf16.msra.mxu1 %v2879_v19 }
 0x7b3   :  { %2888 = vmatprep.subr.bf16.mxu1 %v2887_v22 }
 0x7b5   :  { %2732 = vmatmul.mubr.msk.f32.vlgmr.msra.gmra.mrb[10].mxu1 %vm257_vm1, %v3234_v45 }
 0x7b6   :  { %2734 = vmatprep.mubr.msk.f32.mxu1 %vm257_vm1, %v3237_v47  ;;  %2890 = vmatpush3.bf16.msra.mxu1 %v2887_v22 }
 0x7b9   :  { %2735 = vmatmul.mubr.msk.f32.gmra.mrb[12].mxu1 %vm257_vm1, %v3252_v50 }
 0x7ba   :  { %2737 = vmatprep.mubr.msk.f32.mxu1 %vm257_vm1, %v3212_v32 }
 0x7bd   :  { %2738 = vmatmul.mubr.msk.f32.gmra.mrb[14].mxu1 %vm257_vm1, %v3240_v48 }
 0x7be   :  { %2757 = vmatprep.mubr.msk.f32.mxu1 %vm257_vm1, %v3263_v51 }
 0x7c1   :  { %2758 = vmatmul.mubr.msk.f32.vlgmr.msra.gmra.mrb[16].mxu1 %vm257_vm1, %v3272_v52 }
 0x7c2   :  { %2760 = vmatprep.mubr.msk.f32.mxu1 %vm257_vm1, %v3277_v53 }
 0x7c5   :  { %2761 = vmatmul.mubr.msk.f32.gmra.mrb[18].mxu1 %vm257_vm1, %v3286_v54 }
 0x7c6   :  { %2763 = vmatprep.mubr.msk.f32.mxu1 %vm257_vm1, %v3291_v55 }
 0x7c9   :  { %2764 = vmatmul.mubr.msk.f32.gmra.mrb[20].mxu1 %vm257_vm1, %v3300_v56 }
 0x7ca   :  { %2799 = vmatprep.mubr.msk.f32.mxu1 %vm257_vm1, %v3247_v49 }
 0x823   :  { %v2953_v32 = vpop.permute.xlu0 %2952 }
 0x824   :  { %v2955_v48 = vunpack.i.h.bf16 %v2953_v32  ;;  %v2954_v51 = vunpack.i.l.bf16 %v2953_v32 }
 0x826   :  { %v2883_v23 = vpack.c.bf16 %v2955_v48, %v2954_v51 }
 0x828   :  { %2884 = vmatprep.subr.bf16.mxu0 %v2883_v23 }
 0x829   :  { %2886 = vmatpush3.bf16.msra.mxu0 %v2883_v23 }
 0x82c   :  { %2745 = vmatmul.mubr.msk.f32.vlgmr.msra.gmra.mrb[14].mxu0 %vm257_vm1, %v3318_v0 }
 0x82d   :  { %2747 = vmatprep.mubr.msk.f32.mxu0 %vm257_vm1, %v3324_v1 }
 0x830   :  { %2748 = vmatmul.mubr.msk.f32.gmra.mrb[16].mxu0 %vm257_vm1, %v3336_v2 }
 0x831   :  { %2750 = vmatprep.mubr.msk.f32.mxu0 %vm257_vm1, %v3352_v5 }
 0x834   :  { %2751 = vmatmul.mubr.msk.f32.gmra.mrb[18].mxu0 %vm257_vm1, %v3358_v6 }
 0x835   :  { %2778 = vmatprep.mubr.msk.f32.mxu0 %vm912_vm6, %v3507_v29 }
 0x888   :  { %v3581_v52 = vpop.f32.mrb[10].mxu1 }
 0x889   :  { %v3583_v53 = vpop.f32.mrb[11].mxu1 }
 0x88c   :  { %v3585_v54 = vpop.f32.mrb[12].mxu1 }
 0x88d   :  { %v3587_v55 = vpop.f32.mrb[13].mxu1 }
 0x890   :  { %v3589_v56 = vpop.f32.mrb[14].mxu1 }
 0x891   :  { %v3591_v25 = vpop.f32.mrb[15].mxu1 }
 0x894   :  { %v2759_v28 = vpop.f32.mrb[16].mxu1 }
 0x895   :  { %v1397_v33 = vpop.f32.mrb[17].mxu1  ;;  %1464 = vrot.lane.b32.xlu0 %v2759_v28, %s3039_s2 }
 0x896   :  { %1462 = vrot.lane.b32.xlu1 %v1397_v33, %s3039_s2 }
 0x898   :  { %v2762_v36 = vpop.f32.mrb[18].mxu1 }
 0x899   :  { %v1407_v29 = vpop.f32.mrb[19].mxu1 }
 0x89c   :  { %v2765_v37 = vpop.f32.mrb[20].mxu1 }
 0x89d   :  { %v1417_v38 = vpop.f32.mrb[21].mxu1  ;;  %1472 = vrot.lane.b32.xlu0 %v2765_v37, %s3039_s2 }
 0x89e   :  { %1470 = vrot.lane.b32.xlu1 %v1417_v38, %s3039_s2 }
 0x8ff   :  { %v2746_v39 = vpop.f32.mrb[14].mxu0 }
 0x900   :  { %v1300_v7 = vpop.f32.mrb[15].mxu0  ;;  %1434 = vrot.lane.b32.xlu0 %v2746_v39, %s3039_s2 }
 0x901   :  { %1432 = vrot.lane.b32.xlu1 %v1300_v7, %s3039_s2 }
 0x903   :  { %v2749_v10 = vpop.f32.mrb[16].mxu0 }
 0x904   :  { %v1310_v9 = vpop.f32.mrb[17].mxu0  ;;  %1438 = vrot.lane.b32.xlu0 %v2749_v10, %s3039_s2 }
 0x905   :  { %1436 = vrot.lane.b32.xlu1 %v1310_v9, %s3039_s2 }
 0x907   :  { %v2752_v11 = vpop.f32.mrb[18].mxu0  ;;  %v1465_v12 = vpop.permute.xlu0 %1464 }
 0x908   :  { %v1320_v30 = vpop.f32.mrb[19].mxu0  ;;  %1442 = vrot.lane.b32.xlu0 %v2752_v11, %s3039_s2  ;;  %v1463_v44 = vpop.permute.xlu1 %1462 }
 0x909   :  { %1440 = vrot.lane.b32.xlu1 %v1320_v30, %s3039_s2 }
 0x90c   :  { %1468 = vrot.lane.b32.xlu0 %v2762_v36, %s3039_s2 }
 0x90d   :  { %1466 = vrot.lane.b32.xlu1 %v1407_v29, %s3039_s2 }
 0x90f   :  { %v1473_v60 = vpop.permute.xlu0 %1472 }
 0x910   :  { %v1471_v62 = vpop.permute.xlu1 %1470 }
 0x972   :  { %v1435_v13 = vpop.permute.xlu0 %1434 }
 0x973   :  { %v1451_v14 = vadd.f32 %v3581_v52, %v1435_v13  ;;  %v1433_v15 = vpop.permute.xlu1 %1432 }
 0x974   :  { %v1450_v16 = vadd.f32 %v1433_v15, %v3583_v53 }
 0x975   :  { %v1481_v17 = vadd.f32 %v1465_v12, %v1451_v14 }
 0x976   :  { %v1480_v18 = vadd.f32 %v1463_v44, %v1450_v16  ;;  %v1439_v59 = vpop.permute.xlu0 %1438 }
 0x977   :  { %v1437_v20 = vpop.permute.xlu1 %1436  ;;  %vm1487_vm0 = vcmp.ge.f32.partialorder %v1481_v17, 0.0  ;;  %v1493_v34 = vmul.f32 0.2, %v1481_v17  ;;  %v1453_v42 = vadd.f32 %v3585_v54, %v1439_v59 }
 0x978   :  { %vm1486_vm2 = vcmp.ge.f32.partialorder %v1480_v18, 0.0  ;;  %v1492_v35 = vmul.f32 0.2, %v1480_v18  ;;  %v1452_v19 = vadd.f32 %v1437_v20, %v3587_v55 }
 0x979   :  { %v3607_v24 = vsel %vm1487_vm0, %v1481_v17, %v1493_v34 }
 0x97a   :  { %1511 = vperm.xlu0 %2949, %v3607_v24   ;;  %v1443_v26 = vpop.permute.xlu0 %1442  ;;  %v3610_v21 = vsel %vm1486_vm2, %v1480_v18, %v1492_v35 }
 0x97b   :  { %v1455_v58 = vadd.f32 %v3589_v56, %v1443_v26  ;;  %1506 = vperm.xlu1 %2950, %v3610_v21   ;;  %v1441_v46 = vpop.permute.xlu1 %1440 }
 0x97c   :  { %v1454_v41 = vadd.f32 %v1441_v46, %v3591_v25 }
 0x97d   :  { %v1485_v40 = vadd.f32 %v1473_v60, %v1455_v58 }
 0x97e   :  { %v1484_v22 = vadd.f32 %v1471_v62, %v1454_v41  ;;  %v1469_v32 = vpop.permute.xlu0 %1468 }
 0x97f   :  { %v1483_v48 = vadd.f32 %v1469_v32, %v1453_v42  ;;  %v1467_v51 = vpop.permute.xlu1 %1466  ;;  %vm1491_vm3 = vcmp.ge.f32.partialorder %v1485_v40, 0.0  ;;  %v1497_v23 = vmul.f32 0.2, %v1485_v40 }
 0x980   :  { %v1482_v28 = vadd.f32 %v1467_v51, %v1452_v19  ;;  %vm1490_vm4 = vcmp.ge.f32.partialorder %v1484_v22, 0.0  ;;  %v1496_v33 = vmul.f32 0.2, %v1484_v22 }
 0x981   :  { %v1495_v36 = vmul.f32 0.2, %v1483_v48  ;;  %v3617_v29 = vsel %vm1491_vm3, %v1485_v40, %v1497_v23  ;;  %vm1489_vm5 = vcmp.ge.f32.partialorder %v1483_v48, 0.0 }
 0x982   :  { %v1494_v37 = vmul.f32 0.2, %v1482_v28  ;;  %1531 = vperm.xlu0 %2949, %v3617_v29   ;;  %v3620_v38 = vsel %vm1490_vm4, %v1484_v22, %v1496_v33  ;;  %vm1488_vm8 = vcmp.ge.f32.partialorder %v1482_v28, 0.0 }
 0x983   :  { %1526 = vperm.xlu1 %2950, %v3620_v38   ;;  %v3623_v39 = vsel %vm1489_vm5, %v1483_v48, %v1495_v36 }
 0x984   :  { %v1500_v7 = vsel %vm1488_vm8, %v1482_v28, %v1494_v37 }
 0x986   :  { %1521 = vperm.xlu0 %2949, %v3623_v39  }
 0x987   :  { %1516 = vperm.xlu1 %2950, %v1500_v7  }
 0x9f9   :  { %v1512_v10 = vpop.permute.xlu0 %1511 }
 0x9fa   :  { %v1507_v9 = vpop.permute.xlu1 %1506  ;;  %v1535_v11 = vsel %vm119_vm9, %v1512_v10, -1e+30 }
 0x9fb   :  { %v1534_v30 = vsel %vm118_vm7, %v1507_v9, -1e+30  ;;  %v1541_v14 = vsel %vm257_vm1, %v1535_v11, -inf }
 0x9fc   :  { %v1540_v57 = vsel %vm257_vm1, %v1534_v30, -inf }
 0xa01   :  { %v1532_v12 = vpop.permute.xlu0 %1531 }
 0xa02   :  { %v1539_v44 = vsel %vm123_vm12, %v1532_v12, -1e+30  ;;  %v1527_v60 = vpop.permute.xlu1 %1526 }
 0xa03   :  { %v1546_v62 = vsel %vm257_vm1, %v1539_v44, -inf  ;;  %v1538_v13 = vsel %vm122_vm13, %v1527_v60, -1e+30 }
 0xa04   :  { %v1544_v15 = vsel %vm257_vm1, %v1538_v13, -inf  ;;  %v1547_v43 = vmax.f32 %v1541_v14, %v1546_v62 }
 0xa05   :  { %v1545_v16 = vmax.f32 %v1540_v57, %v1544_v15  ;;  %v1522_v17 = vpop.permute.xlu0 %1521 }
 0xa06   :  { %v1537_v3 = vsel %vm121_vm11, %v1522_v17, -1e+30  ;;  %v1517_v18 = vpop.permute.xlu1 %1516 }
 0xa07   :  { %v1543_v59 = vsel %vm257_vm1, %v1537_v3, -inf  ;;  %v1536_v4 = vsel %vm120_vm10, %v1517_v18, -1e+30  ;;  %v1548_v34 = vmax.f32 %v1545_v16, %v1547_v43 }
 0xa08   :  { %v1542_v20 = vsel %vm257_vm1, %v1536_v4, -inf }
 0xa09   :  { %v1549_v35 = vmax.f32 %v1542_v20, %v1543_v59 }
 0xa0b   :  { %v1550_v26 = vmax.f32 %v1548_v34, %v1549_v35 }
 0xa0d   :  { %v1551_v58 = vrot.slane %v1550_v26, 4 }
 0xa0f   :  { %v1552_v46 = vmax.f32 %v1550_v26, %v1551_v58 }
 0xa11   :  { %v1553_v41 = vrot.slane %v1552_v46, 2 }
 0xa13   :  { %v1554_v42 = vmax.f32 %v1552_v46, %v1553_v41 }
 0xa15   :  { %v1555_v40 = vrot.slane %v1554_v42, 1 }
 0xa17   :  { %v1556_v19 = vmax.f32 %v1554_v42, %v1555_v40 }
 0xa19   :  { %v1558_v63 = vmul.f32 %v3318_v0, %v1556_v19  ;;  %v1557_v22 = vmul.f32 %v3247_v49, %v1556_v19  ;;  %v1559_v61 = vmul.f32 %v3324_v1, %v1556_v19  ;;  %v1560_v48 = vmul.f32 %v3336_v2, %v1556_v19 }
 0xa1a   :  { %v1561_v28 = vmul.f32 %v3352_v5, %v1556_v19  ;;  %v1562_v33 = vmul.f32 %v3358_v6, %v1556_v19 }
 0xa1b   :  { %v1566_v32 = vsel %vm257_vm1, %v1558_v63, 0.0  ;;  %v1563_v27 = vsel %vm257_vm1, %v1557_v22, 0.0  ;;  %v1569_v51 = vsel %vm257_vm1, %v1559_v61, 0.0  ;;  %v1572_v23 = vsel %vm257_vm1, %v1560_v48, 0.0 }
 0xa1c   :  { %1567 = vadd.xlane.f32.xlu0 %v1566_v32  ;;  %1564 = vadd.xlane.f32.xlu1 %v1563_v27  ;;  %v1575_v36 = vsel %vm257_vm1, %v1561_v28, 0.0  ;;  %v1578_v37 = vsel %vm257_vm1, %v1562_v33, 0.0 }
 0xa20   :  { %1570 = vadd.xlane.f32.xlu0 %v1569_v51  ;;  %1573 = vadd.xlane.f32.xlu1 %v1572_v23 }
 0xa24   :  { %1576 = vadd.xlane.f32.xlu0 %v1575_v36  ;;  %1579 = vadd.xlane.f32.xlu1 %v1578_v37 }
 0xaa9   :  { %v1568_v10 = vpop.xlane.xlu0 %1567  ;;  %v1565_v9 = vpop.xlane.xlu1 %1564 }
 0xaaa   :  { %v1582_v11 = vsub.f32 %v3607_v24, %v1568_v10  ;;  %v1581_v30 = vsub.f32 %v3610_v21, %v1565_v9 }
 0xaac   :  { %v1589_v12 = vmul.f32 1.442695, %v1582_v11  ;;  %v1587_v44 = vmul.f32 1.442695, %v1581_v30 }
 0xaad   :  { %v1571_v60 = vpop.xlane.xlu0 %1570  ;;  %v1574_v62 = vpop.xlane.xlu1 %1573 }
 0xaae   :  { %2988 = vpow2.f32 %v1589_v12  ;;  %v1583_v13 = vsub.f32 %v1500_v7, %v1571_v60  ;;  %v1584_v14 = vsub.f32 %v3623_v39, %v1574_v62 }
 0xaaf   :  { %2990 = vpow2.f32 %v1587_v44 }
 0xab0   :  { %v1591_v57 = vmul.f32 1.442695, %v1583_v13  ;;  %v1593_v15 = vmul.f32 1.442695, %v1584_v14 }
 0xab1   :  { %v1577_v43 = vpop.xlane.xlu0 %1576  ;;  %v1580_v16 = vpop.xlane.xlu1 %1579 }
 0xab2   :  { %2992 = vpow2.f32 %v1591_v57  ;;  %v1585_v17 = vsub.f32 %v3620_v38, %v1577_v43  ;;  %v1586_v24 = vsub.f32 %v3617_v29, %v1580_v16 }
 0xab3   :  { %2994 = vpow2.f32 %v1593_v15 }
 0xab4   :  { %v1595_v21 = vmul.f32 1.442695, %v1585_v17  ;;  %v1597_v3 = vmul.f32 1.442695, %v1586_v24 }
 0xab6   :  { %2996 = vpow2.f32 %v1595_v21 }
 0xab7   :  { %2998 = vpow2.f32 %v1597_v3 }
 0xab8   :  { %v3667_v18 = vpop.eup %2988 }
 0xab9   :  { %v3669_v7 = vpop.eup %2990  ;;  %1606 = vperm.xlu1 %2950, %v3667_v18  }
 0xaba   :  { %1601 = vperm.xlu0 %2949, %v3669_v7  }
 0xabc   :  { %v3673_v39 = vpop.eup %2992 }
 0xabd   :  { %v3675_v59 = vpop.eup %2994  ;;  %1611 = vperm.xlu1 %2950, %v3673_v39  }
 0xabe   :  { %1616 = vperm.xlu0 %2949, %v3675_v59  }
 0xac0   :  { %v3679_v29 = vpop.eup %2996 }
 0xac1   :  { %v3681_v38 = vpop.eup %2998  ;;  %1621 = vperm.xlu1 %2950, %v3679_v29  }
 0xac2   :  { %1626 = vperm.xlu0 %2949, %v3681_v38  }
 0xb38   :  { %v1607_v4 = vpop.permute.xlu1 %1606 }
 0xb39   :  { %v1602_v20 = vpop.permute.xlu0 %1601  ;;  %v1630_v34 = vmul.f32 %v3318_v0, %v1607_v4 }
 0xb3a   :  { %v1629_v35 = vmul.f32 %v3247_v49, %v1602_v20 }
 0xb3b   :  { %v1636_v26 = vsel %vm257_vm1, %v1630_v34, 0.0 }
 0xb3c   :  { %v1635_v58 = vsel %vm257_vm1, %v1629_v35, 0.0  ;;  %v1612_v46 = vpop.permute.xlu1 %1611 }
 0xb3d   :  { %v1617_v41 = vpop.permute.xlu0 %1616  ;;  %v1631_v42 = vmul.f32 %v3324_v1, %v1612_v46  ;;  %v1637_v40 = vadd.f32 %v1636_v26, %v1635_v58 }
 0xb3e   :  { %v1632_v19 = vmul.f32 %v3336_v2, %v1617_v41 }
 0xb3f   :  { %v1638_v63 = vsel %vm257_vm1, %v1631_v42, 0.0 }
 0xb40   :  { %v1639_v22 = vadd.f32 %v1638_v63, %v1637_v40  ;;  %v1622_v32 = vpop.permute.xlu1 %1621  ;;  %v1640_v27 = vsel %vm257_vm1, %v1632_v19, 0.0 }
 0xb41   :  { %v1627_v61 = vpop.permute.xlu0 %1626  ;;  %v1633_v48 = vmul.f32 %v3352_v5, %v1622_v32 }
 0xb42   :  { %v1634_v51 = vmul.f32 %v3358_v6, %v1627_v61  ;;  %v1641_v23 = vadd.f32 %v1640_v27, %v1639_v22 }
 0xb43   :  { %v1642_v28 = vsel %vm257_vm1, %v1633_v48, 0.0 }
 0xb44   :  { %v1643_v33 = vadd.f32 %v1642_v28, %v1641_v23  ;;  %v1644_v36 = vsel %vm257_vm1, %v1634_v51, 0.0 }
 0xb46   :  { %v1645_v37 = vadd.f32 %v1644_v36, %v1643_v33 }
 0xb48   :  { %v1646_v10 = vrot.slane %v1645_v37, 4 }
 0xb4a   :  { %v1647_v9 = vadd.f32 %v1646_v10, %v1645_v37  ;;  %v2508_v10 = vld [vmem:[%s3822_s11] ss:$0 sm:$0xff] }
 0xb4c   :  { %v1648_v11 = vrot.slane %v1647_v9, 2 }
 0xb4e   :  { %v1649_v30 = vadd.f32 %v1648_v11, %v1647_v9 }
 0xb50   :  { %v1650_v12 = vrot.slane %v1649_v30, 1 }
 0xb52   :  { %v1651_v44 = vadd.f32 %v1650_v12, %v1649_v30 }
 0xb54   :  { %v1653_v60 = vmul.f32 %v3318_v0, %v1651_v44  ;;  %v1652_v62 = vmul.f32 %v3247_v49, %v1651_v44  ;;  %v1654_v57 = vmul.f32 %v3324_v1, %v1651_v44  ;;  %v1655_v15 = vmul.f32 %v3336_v2, %v1651_v44 }
 0xb55   :  { %v1656_v17 = vmul.f32 %v3352_v5, %v1651_v44  ;;  %v1657_v24 = vmul.f32 %v3358_v6, %v1651_v44 }
 0xb56   :  { %v1661_v13 = vsel %vm257_vm1, %v1653_v60, 0.0  ;;  %v1658_v14 = vsel %vm257_vm1, %v1652_v62, 0.0  ;;  %v1664_v43 = vsel %vm257_vm1, %v1654_v57, 0.0  ;;  %v1667_v16 = vsel %vm257_vm1, %v1655_v15, 0.0 }
 0xb57   :  { %1662 = vadd.xlane.f32.xlu0 %v1661_v13  ;;  %1659 = vadd.xlane.f32.xlu1 %v1658_v14  ;;  %v1670_v49 = vsel %vm257_vm1, %v1656_v17, 0.0  ;;  %v1673_v21 = vsel %vm257_vm1, %v1657_v24, 0.0 }
 0xb5b   :  { %1665 = vadd.xlane.f32.xlu0 %v1664_v43  ;;  %1668 = vadd.xlane.f32.xlu1 %v1667_v16 }
 0xb5f   :  { %1671 = vadd.xlane.f32.xlu0 %v1670_v49  ;;  %1674 = vadd.xlane.f32.xlu1 %v1673_v21 }
 0xbe4   :  { %v1663_v3 = vpop.xlane.xlu0 %1662  ;;  %v1660_v4 = vpop.xlane.xlu1 %1659 }
 0xbe5   :  { %3000 = vrcp.f32 %v1663_v3 }
 0xbe6   :  { %3002 = vrcp.f32 %v1660_v4 }
 0xbe8   :  { %v1666_v20 = vpop.xlane.xlu0 %1665  ;;  %v1669_v34 = vpop.xlane.xlu1 %1668 }
 0xbe9   :  { %3004 = vrcp.f32 %v1666_v20 }
 0xbea   :  { %3006 = vrcp.f32 %v1669_v34 }
 0xbec   :  { %v1672_v35 = vpop.xlane.xlu0 %1671  ;;  %v1675_v5 = vpop.xlane.xlu1 %1674 }
 0xbed   :  { %3008 = vrcp.f32 %v1672_v35 }
 0xbee   :  { %3010 = vrcp.f32 %v1675_v5 }
 0xbef   :  { %v3001_v6 = vpop.eup %3000 }
 0xbf0   :  { %v3003_v26 = vpop.eup %3002  ;;  %v1679_v58 = vmul.f32 %v3001_v6, %v3667_v18 }
 0xbf1   :  { %v1677_v46 = vmul.f32 %v3003_v26, %v3669_v7 }
 0xbf2   :  { %1695 = vperm.xlu1 %2950, %v1679_v58  }
 0xbf3   :  { %v3005_v41 = vpop.eup %3004  ;;  %1690 = vperm.xlu0 %2949, %v1677_v46  }
 0xbf4   :  { %v3007_v42 = vpop.eup %3006  ;;  %v1681_v40 = vmul.f32 %v3005_v41, %v3673_v39 }
 0xbf5   :  { %v1683_v19 = vmul.f32 %v3007_v42, %v3675_v59 }
 0xbf6   :  { %1700 = vperm.xlu1 %2950, %v1681_v40  }
 0xbf7   :  { %v3009_v63 = vpop.eup %3008  ;;  %1705 = vperm.xlu0 %2949, %v1683_v19  }
 0xbf8   :  { %v3011_v22 = vpop.eup %3010  ;;  %v1685_v32 = vmul.f32 %v3009_v63, %v3679_v29 }
 0xbf9   :  { %v1687_v27 = vmul.f32 %v3011_v22, %v3681_v38 }
 0xbfa   :  { %1710 = vperm.xlu1 %2950, %v1685_v32  }
 0xbfb   :  { %1715 = vperm.xlu0 %2949, %v1687_v27  }
 0xc71   :  { %v1696_v18 = vpop.permute.xlu1 %1695 }
 0xc72   :  { %v1691_v7 = vpop.permute.xlu0 %1690  ;;  %v1719_v61 = vmul.f32 %v3581_v52, %v1696_v18 }
 0xc73   :  { %v1718_v48 = vmul.f32 %v1691_v7, %v3583_v53  ;;  %v1860_v53 = vld [vmem:[%s3820_s12] sm:$0xff] }
 0xc75   :  { %v2891_v51 = vpack.c.bf16 %v1719_v61, %v1718_v48  ;;  %v1701_v39 = vpop.permute.xlu1 %1700 }
 0xc76   :  { %v1706_v23 = vpop.permute.xlu0 %1705  ;;  %v1720_v59 = vmul.f32 %v1701_v39, %v3587_v55 }
 0xc77   :  { %v1721_v28 = vmul.f32 %v3585_v54, %v1706_v23  ;;  %2892 = vmatprep.subr.bf16.mxu0 %v2891_v51  ;;  %v1861_v54 = vld [vmem:[%s3820_s12 + $0x8] sm:$0xff] }
 0xc78   :  { %2894 = vmatpush3.bf16.msra.mxu0 %v2891_v51  ;;  %v2903_v55 = vpack.c.bf16 %v1861_v54, %v1860_v53 }
 0xc79   :  { %v2895_v29 = vpack.c.bf16 %v1721_v28, %v1720_v59  ;;  %v1711_v33 = vpop.permute.xlu1 %1710 }
 0xc7a   :  { %v1716_v38 = vpop.permute.xlu0 %1715  ;;  %v1722_v36 = vmul.f32 %v1711_v33, %v3591_v25  ;;  %v1944_v25 = vld [vmem:[%s3821_s13 + $0x8] sm:$0xff] }
 0xc7b   :  { %v1723_v37 = vmul.f32 %v3589_v56, %v1716_v38  ;;  %2896 = vmatprep.subr.bf16.mxu0 %v2895_v29  ;;  %v1943_v56 = vld [vmem:[%s3821_s13] sm:$0xff] }
 0xc7c   :  { %2898 = vmatpush3.bf16.msra.mxu0 %v2895_v29 }
 0xc7d   :  { %v2899_v52 = vpack.c.bf16 %v1723_v37, %v1722_v36 }
 0xc7f   :  { %2900 = vmatprep.subr.bf16.mxu0 %v2899_v52 }
 0xc80   :  { %2902 = vmatpush3.bf16.msra.mxu0 %v2899_v52 }
 0xc81   :  { %2904 = vmatprep.subr.bf16.mxu0 %v2903_v55 }
 0xc83   :  { %2779 = vmatmul.mubr.msk.f32.vlgmr.msra.gmra.mrb[20].mxu0 %vm912_vm6, %v3519_v8  ;;  %v3735_v8 = vpack.c.bf16 %v1944_v25, %v1943_v56 }
 0xc84   :  { %2906 = vmatpush3.bf16.msra.mxu0 %v2903_v55 }
 0xc85   :  { %2908 = vmatprep.subr.bf16.mxu0 %v3735_v8 }
 0xd56   :  { %v2780_v9 = vpop.f32.mrb[20].mxu0 }
 0xd57   :  { %v1803_v11 = vadd.f32 %v2780_v9, %v2508_v10  ;;  %v1797_v30 = vpop.f32.mrb[21].mxu0 }
 0xd58   :  { %v1798_v12 = vadd.f32 %v2508_v10, %v1797_v30 }
 0xd59   :  { %v1807_v44 = vmul.f32 0.70710677, %v1803_v11  ;;  %v1855_v54 = vmul.f32 0.5, %v1803_v11  ;;  %v2194_v11 = vld [vmem:[%s3823_s14] sm:$0xff] }
 0xd5a   :  { %v1806_v60 = vmul.f32 0.70710677, %v1798_v12  ;;  %v1854_v52 = vmul.f32 0.5, %v1798_v12 }
 0xd5b   :  { %v1809_v62 = vand.u32 2147483647, %v1807_v44  ;;  %vm1849_vm7 = vcmp.ge.f32.partialorder %v1807_v44, 0.0 }
 0xd5c   :  { %v1808_v13 = vand.u32 2147483647, %v1806_v60  ;;  %vm1848_vm9 = vcmp.ge.f32.partialorder %v1806_v60, 0.0  ;;  %v2195_v60 = vld [vmem:[%s3823_s14 + $0x8] sm:$0xff] }
 0xd5d   :  { %v1811_v14 = vmul.f32 0.3275911, %v1809_v62  ;;  %v1837_v16 = vsub.f32 0.0, %v1809_v62 }
 0xd5e   :  { %v1810_v57 = vmul.f32 0.3275911, %v1808_v13  ;;  %v1836_v17 = vsub.f32 0.0, %v1808_v13 }
 0xd5f   :  { %v1813_v15 = vadd.f32 1.0, %v1811_v14  ;;  %v1839_v49 = vmul.f32 %v1837_v16, %v1809_v62  ;;  %v2527_v62 = vld [vmem:[%s3826_s15] ss:$0 sm:$0xff] }
 0xd60   :  { %v1812_v43 = vadd.f32 1.0, %v1810_v57  ;;  %v1838_v4 = vmul.f32 %v1836_v17, %v1808_v13 }
 0xd61   :  { %3012 = vrcp.f32 %v1813_v15  ;;  %v1842_v35 = vmul.f32 1.442695, %v1839_v49 }
 0xd62   :  { %3014 = vrcp.f32 %v1812_v43  ;;  %v1840_v26 = vmul.f32 1.442695, %v1838_v4 }
 0xd63   :  { %3016 = vpow2.f32 %v1842_v35 }
 0xd64   :  { %3018 = vpow2.f32 %v1840_v26 }
 0xd6b   :  { %v3013_v24 = vpop.eup %3012 }
 0xd6c   :  { %v3015_v21 = vpop.eup %3014  ;;  %v1819_v3 = vmul.f32 1.0614054, %v3013_v24 }
 0xd6d   :  { %v1818_v20 = vmul.f32 1.0614054, %v3015_v21  ;;  %v3017_v61 = vpop.eup %3016 }
 0xd6e   :  { %v1821_v34 = vadd.f32 -1.4531521, %v1819_v3  ;;  %v3019_v51 = vpop.eup %3018 }
 0xd6f   :  { %v1820_v5 = vadd.f32 -1.4531521, %v1818_v20  ;;  %v2528_v20 = vld [vmem:[%s3827_s17] ss:$0 sm:$0xff] }
 0xd70   :  { %v1823_v6 = vmul.f32 %v3013_v24, %v1821_v34 }
 0xd71   :  { %v1822_v58 = vmul.f32 %v3015_v21, %v1820_v5 }
 0xd72   :  { %v1825_v46 = vadd.f32 1.4214138, %v1823_v6 }
 0xd73   :  { %v1824_v41 = vadd.f32 1.4214138, %v1822_v58 }
 0xd74   :  { %v1827_v42 = vmul.f32 %v3013_v24, %v1825_v46 }
 0xd75   :  { %v1826_v40 = vmul.f32 %v3015_v21, %v1824_v41 }
 0xd76   :  { %v1829_v19 = vadd.f32 -0.28449672, %v1827_v42 }
 0xd77   :  { %v1828_v63 = vadd.f32 -0.28449672, %v1826_v40 }
 0xd78   :  { %v1831_v22 = vmul.f32 %v3013_v24, %v1829_v19 }
 0xd79   :  { %v1830_v32 = vmul.f32 %v3015_v21, %v1828_v63 }
 0xd7a   :  { %v1833_v27 = vadd.f32 0.2548296, %v1831_v22 }
 0xd7b   :  { %v1832_v18 = vadd.f32 0.2548296, %v1830_v32 }
 0xd7c   :  { %v1835_v7 = vmul.f32 %v3013_v24, %v1833_v27 }
 0xd7d   :  { %v1834_v48 = vmul.f32 %v3015_v21, %v1832_v18 }
 0xd7e   :  { %v1845_v39 = vmul.f32 %v3017_v61, %v1835_v7 }
 0xd7f   :  { %v1844_v23 = vmul.f32 %v3019_v51, %v1834_v48 }
 0xd80   :  { %v1847_v59 = vsub.f32 1.0, %v1845_v39 }
 0xd81   :  { %v1846_v28 = vsub.f32 1.0, %v1844_v23 }
 0xd82   :  { %v1851_v29 = vsub.f32 0.0, %v1847_v59 }
 0xd83   :  { %v1850_v33 = vsub.f32 0.0, %v1846_v28 }
 0xd84   :  { %v1853_v38 = vsel %vm1849_vm7, %v1847_v59, %v1851_v29 }
 0xd85   :  { %v1857_v36 = vadd.f32 1.0, %v1853_v38  ;;  %v1852_v37 = vsel %vm1848_vm9, %v1846_v28, %v1850_v33 }
 0xd86   :  { %v1856_v53 = vadd.f32 1.0, %v1852_v37 }
 0xd87   :  { %v1859_v56 = vmul.f32 %v1857_v36, %v1855_v54 }
 0xd88   :  { %v1858_v55 = vmul.f32 %v1856_v53, %v1854_v52 }
 0xd8a   :  { %2785 = vmatprep.mubr.msk.f32.mxu0 %vm257_vm1, %v1858_v55 }
 0xd8b   :  { %2786 = vmatmul.mubr.msk.f32.vlgmr.msra.gmra.mrb[22].mxu0 %vm257_vm1, %v1859_v56 }
 0xd8c   :  { %2910 = vmatpush3.bf16.msra.mxu0 %v3735_v8  ;;  %2792 = vmatprep.mubr.msk.f32.mxu0 %vm257_vm1, %v1858_v55  ;;  %v2919_v8 = vpack.c.bf16 %v2195_v60, %v2194_v11 }
 0xd8f   :  { %2793 = vmatmul.mubr.msk.f32.vlgmr.msra.gmra.mrb[24].mxu0 %vm257_vm1, %v1859_v56 }
 0xe5e   :  { %v2787_v25 = vpop.f32.mrb[22].mxu0 }
 0xe5f   :  { %v1934_v10 = vpop.f32.mrb[23].mxu0 }
 0xe60   :  { %v2915_v9 = vpack.c.bf16 %v2787_v25, %v1934_v10 }
 0xe62   :  { %v2794_v30 = vpop.f32.mrb[24].mxu0 }
 0xe63   :  { %v2011_v44 = vpop.f32.mrb[25].mxu0 }
 0xe64   :  { %v2911_v12 = vpack.c.bf16 %v2794_v30, %v2011_v44 }
 0xe66   :  { %2912 = vmatprep.subr.bf16.mxu1 %v2911_v12 }
 0xe67   :  { %2914 = vmatpush3.bf16.msra.mxu1 %v2911_v12 }
 0xe68   :  { %2916 = vmatprep.subr.bf16.mxu1 %v2915_v9 }
 0xe6a   :  { %2800 = vmatmul.mubr.msk.f32.vlgmr.msra.gmra.mrb[22].mxu1 %vm257_vm1, %v3318_v0  ;;  %v2190_v0 = vld [vmem:[%s3824_s1] sm:$0xff] }
 0xe6b   :  { %2802 = vmatprep.mubr.msk.f32.mxu1 %vm257_vm1, %v3324_v1  ;;  %2918 = vmatpush3.bf16.msra.mxu1 %v2915_v9  ;;  %v2313_v1 = vld [vmem:[%s3825_s16 + $0x8] sm:$0xff] }
 0xe6c   :  { %2920 = vmatprep.subr.bf16.mxu1 %v2919_v8 }
 0xe6e   :  { %2803 = vmatmul.mubr.msk.f32.gmra.mrb[24].mxu1 %vm257_vm1, %v3336_v2 }
 0xe6f   :  { %2809 = vmatprep.mubr.msk.f32.mxu1 %vm257_vm1, %v3206_v31  ;;  %v2191_v31 = vld [vmem:[%s3824_s1 + $0x8] sm:$0xff] }
 0xe72   :  { %2810 = vmatmul.mubr.msk.f32.vlgmr.msra.gmra.mrb[22].mxu1 %vm257_vm1, %v3234_v45  ;;  %v2192_v45 = vld [vmem:[%s3824_s1 + $0x10] sm:$0xff] }
 0xe73   :  { %2812 = vmatprep.mubr.msk.f32.mxu1 %vm257_vm1, %v3237_v47  ;;  %2922 = vmatpush3.bf16.msra.mxu1 %v2919_v8  ;;  %v2193_v47 = vld [vmem:[%s3824_s1 + $0x18] sm:$0xff] }
 0xe76   :  { %2813 = vmatmul.mubr.msk.f32.gmra.mrb[24].mxu1 %vm257_vm1, %v3252_v50  ;;  %v2312_v50 = vld [vmem:[%s3825_s16] sm:$0xff] }
 0xe77   :  { %2819 = vmatprep.mubr.msk.f32.mxu1 %vm257_vm1, %v2190_v0  ;;  %v2923_v2 = vpack.c.bf16 %v2313_v1, %v2312_v50 }
 0xe79   :  { %2924 = vmatprep.subr.bf16.mxu0 %v2923_v2 }
 0xe7a   :  { %2820 = vmatmul.mubr.msk.f32.vlgmr.msra.gmra.mrb[22].mxu1 %vm257_vm1, %v2191_v31  ;;  %2926 = vmatpush3.bf16.msra.mxu0 %v2923_v2 }
 0xe7b   :  { %2822 = vmatprep.mubr.msk.f32.mxu1 %vm257_vm1, %v2192_v45 }
 0xe7e   :  { %2823 = vmatmul.mubr.msk.f32.gmra.mrb[24].mxu1 %vm257_vm1, %v2193_v47 }
 0xf4d   :  { %v2821_v13 = vpop.f32.mrb[22].mxu1 }
 0xf4e   :  { %v2305_v14 = vadd.f32 %v2821_v13, %v2527_v62  ;;  %v2274_v57 = vpop.f32.mrb[23].mxu1 }
 0xf4f   :  { %v2304_v15 = vadd.f32 %v2527_v62, %v2274_v57 }
 0xf50   :  { %v2309_v17 = vmax.f32 %v2305_v14, 0.0 }
 0xf51   :  { %v2308_v43 = vmax.f32 %v2304_v15, 0.0  ;;  %v2824_v16 = vpop.f32.mrb[24].mxu1 }
 0xf52   :  { %v2307_v24 = vadd.f32 %v2824_v16, %v2527_v62  ;;  %v2284_v49 = vpop.f32.mrb[25].mxu1 }
 0xf53   :  { %v2306_v21 = vadd.f32 %v2527_v62, %v2284_v49  ;;  %2829 = vmatprep.mubr.msk.f32.mxu0 %vm257_vm1, %v2308_v43 }
 0xf54   :  { %2830 = vmatmul.mubr.msk.f32.vlgmr.msra.gmra.mrb[26].mxu0 %vm257_vm1, %v2309_v17  ;;  %v2311_v4 = vmax.f32 %v2307_v24, 0.0 }
 0xf55   :  { %v2310_v3 = vmax.f32 %v2306_v21, 0.0 }
 0xf57   :  { %2832 = vmatprep.mubr.msk.f32.mxu0 %vm257_vm1, %v2310_v3 }
 0xf58   :  { %2833 = vmatmul.mubr.msk.f32.gmra.mrb[28].mxu0 %vm257_vm1, %v2311_v4 }
0x1027   :  { %v2831_v34 = vpop.f32.mrb[26].mxu0 }
0x1028   :  { %v2405_v35 = vadd.f32 %v2831_v34, %v2528_v20  ;;  %v2399_v5 = vpop.f32.mrb[27].mxu0 }
0x1029   :  { %v2400_v6 = vadd.f32 %v2528_v20, %v2399_v5 }
0x102a   :  { %v2534_v26 = vmul.f32 -1.442695, %v2405_v35 }
0x102b   :  { %v2533_v58 = vmul.f32 -1.442695, %v2400_v6  ;;  %v2834_v46 = vpop.f32.mrb[28].mxu0 }
0x102c   :  { %3020 = vpow2.f32 %v2534_v26  ;;  %v2415_v41 = vadd.f32 %v2834_v46, %v2528_v20  ;;  %v2409_v42 = vpop.f32.mrb[29].mxu0 }
0x102d   :  { %3022 = vpow2.f32 %v2533_v58  ;;  %v2410_v40 = vadd.f32 %v2528_v20, %v2409_v42 }
0x102e   :  { %v2536_v19 = vmul.f32 -1.442695, %v2415_v41 }
0x102f   :  { %v2535_v63 = vmul.f32 -1.442695, %v2410_v40 }
0x1030   :  { %3024 = vpow2.f32 %v2536_v19 }
0x1031   :  { %3026 = vpow2.f32 %v2535_v63 }
0x1036   :  { %v3021_v22 = vpop.eup %3020 }
0x1037   :  { %v3023_v32 = vpop.eup %3022  ;;  %v2431_v27 = vadd.f32 1.0, %v3021_v22 }
0x1038   :  { %v2430_v18 = vadd.f32 1.0, %v3023_v32 }
0x1039   :  { %3028 = vrcp.f32 %v2431_v27 }
0x103a   :  { %v3025_v7 = vpop.eup %3024  ;;  %3030 = vrcp.f32 %v2430_v18 }
0x103b   :  { %v3027_v61 = vpop.eup %3026  ;;  %v2433_v48 = vadd.f32 1.0, %v3025_v7 }
0x103c   :  { %v2432_v51 = vadd.f32 1.0, %v3027_v61 }
0x103d   :  { %3032 = vrcp.f32 %v2433_v48 }
0x103e   :  { %3034 = vrcp.f32 %v2432_v51 }
0x1043   :  { %v3029_v39 = vpop.eup %3028 }
0x1044   :  { %v3031_v23 = vpop.eup %3030  ;;  %2443 = vst [vmem:[%s3828_s18 + $0x8] sm:$0xff] %v3029_v39 }
0x1045   :  { %2442 = vst [vmem:[%s3828_s18] sm:$0xff] %v3031_v23 }
0x1047   :  { %v3033_v59 = vpop.eup %3032 }
0x1048   :  { %v3035_v28 = vpop.eup %3034  ;;  %2445 = vst [vmem:[%s3828_s18 + $0x18] sm:$0xff] %v3033_v59 }
0x1049   :  { %2444 = vst [vmem:[%s3828_s18 + $0x10] sm:$0xff] %v3035_v28 }

</bundles_post_ra>
